<compile_context>
chip_gen: v7x
topology: tpu7x:2x2x1
jax: 0.10.0
libtpu: 0.0.40
codegen_flags: <defaults>
</compile_context>

<pallas_src>
import functools

import numpy as np
import jax
import jax.numpy as jnp
from jax.experimental import pallas as pl
from jax.experimental.pallas import tpu as pltpu

# The reference module relies on a global `block_ch` that is not defined in the snippet;
# we pick a small deterministic configuration consistent with its usage.
block_ch = [(8, 16), (16, 32)]


# ----------------------------- static layer configs --------------------------
def build_layer_configs(img_ch, H0, W0, N):
    """Static (Python-int) description of every conv layer in forward order."""
    depth = len(block_ch) + 1
    assert H0 % (2 ** depth) == 0 and W0 % (2 ** depth) == 0, (
        "H0/W0 must be divisible by 2**(len(block_ch)+1)")
    start_ch = block_ch[0][0]
    cfgs = []
    H, W = H0, W0
    # from_rgb + encoder blocks: Conv(k4,s2,p1) + LeakyReLU(0.2) + BatchNorm
    for cin, cout in [(img_ch, start_ch)] + list(block_ch):
        cfgs.append(dict(cin=cin, cout=cout, H=H, W=W, OH=H // 2, OW=W // 2,
                         k=4, s=2, p=1, up=False, pre_relu=False, leaky=True,
                         bn=True, skip=None))
        H, W = H // 2, W // 2
    # decoder blocks: ReLU + Upsample(2) + Conv(k3,s1,p1) + BatchNorm
    rev = block_ch[::-1]
    for i, (cout, cin) in enumerate(rev):
        cin_eff = cin * 2 if i > 0 else cin
        skip = (len(block_ch) - i) if i > 0 else None   # index into the activations list
        cfgs.append(dict(cin=cin_eff, cout=cout, H=H, W=W, OH=H * 2, OW=W * 2,
                         k=3, s=1, p=1, up=True, pre_relu=True, leaky=False,
                         bn=True, skip=skip))
        H, W = H * 2, W * 2
    # to_rgb: ReLU + Upsample(2) + Conv(k3,s1,p1)
    cfgs.append(dict(cin=start_ch, cout=img_ch // 2, H=H, W=W, OH=H * 2, OW=W * 2,
                     k=3, s=1, p=1, up=True, pre_relu=True, leaky=False,
                     bn=False, skip=None))
    return cfgs


# -------------------- constant selection matrices (numpy) --------------------
def _left_matrix_np(c, N):
    """A = vstack_i( I_N kron A_i ), A_i[oh, h] selects the H-source row of tap i
    (folds H padding, H upsample and H stride).  Shape: [k*N*OH, N*H_in]."""
    k, s, p, up = c['k'], c['s'], c['p'], c['up']
    H_in, OH = c['H'], c['OH']
    hmax = 2 * H_in if up else H_in
    blocks = []
    for i in range(k):
        A = np.zeros((OH, H_in), np.float32)
        for oh in range(OH):
            hm = s * oh + i - p
            if 0 <= hm < hmax:
                A[oh, hm // 2 if up else hm] = 1.0
        blocks.append(np.kron(np.eye(N, dtype=np.float32), A))
    return np.concatenate(blocks, axis=0)


def _w_select_np(c):
    """S[w, ow, j] = 1 iff input column w feeds output column ow through W-tap j
    (folds W padding, W upsample and W stride).  Shape: [W_in, OW, k]."""
    k, s, p, up = c['k'], c['s'], c['p'], c['up']
    W_in, OW = c['W'], c['OW']
    wmax = 2 * W_in if up else W_in
    S = np.zeros((W_in, OW, k), np.float32)
    for ow in range(OW):
        for j in range(k):
            wm = s * ow + j - p
            if 0 <= wm < wmax:
                S[wm // 2 if up else wm, ow, j] = 1.0
    return S


def _rpad8(n):
    return ((n + 7) // 8) * 8


# ---------------- pack all kernel operands (once, numpy, wrapper side) --------
def _build_kernel_operands(params, cfgs, N):
    """Fold conv weights + padding/stride/upsample selections into dense constant slabs.

    Runs entirely in numpy at construction time (review item #1: nothing on-device, nothing
    inside the per-call jit).  Packs are tightly row-concatenated, 8-row-aligned 2-D arrays.
    """
    a_col_pad = max(N * c['H'] for c in cfgs)
    b_col_pad = max(c['k'] * c['OW'] * c['cout'] for c in cfgs)
    s_col_pad = max(c['OW'] * c['cout'] for c in cfgs)

    a_blocks, b_blocks, p_blocks, s_rows, layers = [], [], [], [], []
    a_off = 0
    b_off_total = 0
    p_off_total = 0
    p_cache = {}
    needed_skips = {c['skip'] for c in cfgs if c['skip'] is not None}

    for li, (c, pr) in enumerate(zip(cfgs, params)):
        w = np.asarray(pr['w'], np.float32)          # [kH, kW, cin_eff, cout]
        bias = np.asarray(pr['b'], np.float32)
        gamma = np.asarray(pr['gamma'], np.float32)
        beta = np.asarray(pr['beta'], np.float32)

        # --- A: H-tap selection (one per layer, shared by both skip branches) ---
        A = _left_matrix_np(c, N)
        a_rows, a_cols = A.shape
        Ap = np.zeros((_rpad8(a_rows), a_col_pad), np.float32)
        Ap[:a_rows, :a_cols] = A
        a_blocks.append(Ap)

        # --- Bcat: all k H-taps hstacked -> ONE in-kernel matmul per branch ---
        S = _w_select_np(c)                          # [W_in, OW, k]
        k, OW, cout = c['k'], c['OW'], c['cout']
        owoc = OW * cout

        def pack_branch(w_part):
            nonlocal b_off_total
            cc = w_part.shape[2]
            wc = c['W'] * cc
            # Bcat[(w,cin), i*owoc + (ow,cout)] = sum_j S[w,ow,j] * w_part[i,j,cin,cout]
            Bcat = np.einsum('uoj,ijcd->uciod', S, w_part).reshape(wc, k * owoc)
            Bp = np.zeros((_rpad8(wc), b_col_pad), np.float32)
            Bp[:wc, :k * owoc] = Bcat
            b_blocks.append(Bp)
            off = b_off_total
            b_off_total += Bp.shape[0]
            return off, wc

        if c['skip'] is not None:
            cm = c['cin'] // 2                       # cat order: [x, skip] along channels
            b_off, wc = pack_branch(w[:, :, :cm, :])
            b2_off, wc2 = pack_branch(w[:, :, cm:, :])
        else:
            b_off, wc = pack_branch(w)
            b2_off, wc2 = None, None

        # --- per-layer bias / BN affine rows (tiled over ow so they add in-layout) ---
        srow = np.zeros((3, s_col_pad), np.float32)
        srow[0, :owoc] = np.tile(bias, OW)
        srow[1, :owoc] = np.tile(gamma, OW)
        srow[2, :owoc] = np.tile(beta, OW)
        s_rows.append(srow)

        # --- channel-pool matrix for BN stats (deduplicated across layers) ---
        p_off = None
        if c['bn']:
            key = (OW, cout)
            if key not in p_cache:
                q = np.arange(owoc)
                P = (q[:, None] % cout == q[None, :] % cout).astype(np.float32)
                Pp = np.zeros((_rpad8(owoc), s_col_pad), np.float32)
                Pp[:owoc, :owoc] = P
                p_blocks.append(Pp)
                p_cache[key] = p_off_total
                p_off_total += Pp.shape[0]
            p_off = p_cache[key]

        layers.append(dict(
            a_off=a_off, a_rows=a_rows, a_cols=a_cols,
            n_oh=N * c['OH'], k=k, owoc=owoc,
            b_off=b_off, wc=wc, b2_off=b2_off, wc2=wc2,
            m_total=N * c['OH'] * c['OW'],
            pre_relu=c['pre_relu'], leaky=c['leaky'], bn=c['bn'],
            p_off=p_off, skip_src=c['skip'], save=(li in needed_skips)))
        a_off += Ap.shape[0]

    A_pack = np.concatenate(a_blocks, axis=0)                       # [sum_a_rows, a_col_pad]
    B_pack = np.concatenate(b_blocks, axis=0)                       # [sum_b_rows, b_col_pad]
    P_pack = (np.concatenate(p_blocks, axis=0) if p_blocks
              else np.zeros((8, s_col_pad), np.float32))            # [sum_p_rows, s_col_pad]
    S_pack = np.stack(s_rows, axis=0)                               # [n_layers, 3, s_col_pad]
    return (A_pack, B_pack, P_pack, S_pack), tuple(layers)


# ------------------------------ fused kernel ----------------------------------
def _generator_kernel(x_ref, a_ref, b_ref, p_ref, s_ref, o_ref, *,
                      layers, neg_slope, eps):
    """Whole Generator forward on VMEM-resident data; activations are [N*H, W*C]."""

    def conv_branch(xin, L, b_off, wc):
        # 2 MXU ops per branch: U = A @ X (all H taps stacked on rows),
        # T = U @ Bcat (all H taps stacked on lanes), then sum the diagonal blocks.
        A = a_ref[L['a_off']:L['a_off'] + L['a_rows'], 0:L['a_cols']]
        U = jnp.dot(A, xin, preferred_element_type=jnp.float32)
        Bcat = b_ref[b_off:b_off + wc, 0:L['k'] * L['owoc']]
        T = jnp.dot(U, Bcat, preferred_element_type=jnp.float32)
        n_oh, owoc = L['n_oh'], L['owoc']
        acc = T[0:n_oh, 0:owoc]
        for i in range(1, L['k']):
            acc = acc + T[i * n_oh:(i + 1) * n_oh, i * owoc:(i + 1) * owoc]
        return acc

    saved = {}                       # only the skip source(s) are kept live (opt #5)
    cur = x_ref[...]
    for li, L in enumerate(layers):
        xin = jnp.maximum(cur, 0.0) if L['pre_relu'] else cur
        y = conv_branch(xin, L, L['b_off'], L['wc'])
        if L['skip_src'] is not None:
            # conv(cat([x, skip])) == conv_x(x) + conv_skip(skip); ReLU/Upsample commute with cat.
            # TODO(synk): the v6e lane-concat merge of the two A-stages is left out to keep the
            #             lowering of sub-128-lane concatenates out of the critical path.
            xs = jnp.maximum(saved[L['skip_src']], 0.0)
            y = y + conv_branch(xs, L, L['b2_off'], L['wc2'])

        sp = s_ref[li]                       # [3, s_col_pad]
        owoc = L['owoc']
        y = y + sp[0:1, 0:owoc]              # conv bias (tiled over ow)

        if L['leaky']:
            y = jnp.where(y >= 0.0, y, neg_slope * y)

        if L['bn']:
            # Training-mode BatchNorm: biased batch stats over (N, OH, OW) per channel.
            # Row-sums first (XLU), then ONE tiny [1,owoc] @ [owoc,owoc] pool matmul per moment.
            P = p_ref[L['p_off']:L['p_off'] + owoc, 0:owoc]
            inv_m = 1.0 / float(L['m_total'])
            s1 = jnp.sum(y, axis=0, keepdims=True)
            s2 = jnp.sum(y * y, axis=0, keepdims=True)
            mean = jnp.dot(s1, P, preferred_element_type=jnp.float32) * inv_m
            ex2 = jnp.dot(s2, P, preferred_element_type=jnp.float32) * inv_m
            var = ex2 - mean * mean
            gamma = sp[1:2, 0:owoc]
            beta = sp[2:3, 0:owoc]
            y = (y - mean) * (jax.lax.rsqrt(var + eps) * gamma) + beta

        if L['save']:
            saved[li] = y
        cur = y
    # Final store is [N*OH, OW*cout] (16 lanes here); volume is tiny so the masked store is
    # accepted rather than padding the last layer's lane extent.
    o_ref[...] = cur


# ----------------------------- parameters ------------------------------------
def init_params(key, img_ch=2):
    cfgs = build_layer_configs(img_ch, 16, 16, 2)   # H0/W0/N do not affect param shapes
    keys = jax.random.split(key, len(cfgs))
    params = []
    for kk, c in zip(keys, cfgs):
        k1, k2 = jax.random.split(kk)
        fan_in = c['k'] * c['k'] * c['cin']
        w = jax.random.normal(k1, (c['k'], c['k'], c['cin'], c['cout']),
                              jnp.float32) / jnp.sqrt(float(fan_in))
        b = jax.random.normal(k2, (c['cout'],), jnp.float32) * 0.01
        params.append(dict(w=w, b=b,
                           gamma=jnp.ones((c['cout'],), jnp.float32),    # BN weight (PyTorch init)
                           beta=jnp.zeros((c['cout'],), jnp.float32)))   # BN bias   (PyTorch init)
    return params


# ------------------------------ forward --------------------------------------
def make_generator(params, *, img_ch, H, W, N):
    """Pack parameters once (numpy, host-side) and return a jitted forward fn."""
    cfgs = build_layer_configs(img_ch, H, W, N)
    (A_np, B_np, P_np, S_np), layers = _build_kernel_operands(params, cfgs, N)
    A_pack = jnp.asarray(A_np)
    B_pack = jnp.asarray(B_np)
    P_pack = jnp.asarray(P_np)
    S_pack = jnp.asarray(S_np)

    last = cfgs[-1]
    out_rows, out_cols = N * last['OH'], last['OW'] * last['cout']

    kernel = functools.partial(_generator_kernel, layers=layers,
                               neg_slope=0.2, eps=1e-5)
    # Everything is tiny (< 1 MiB total), so the whole network runs as one VMEM-resident
    # invocation: no grid, whole-array blocks, single dispatch.
    call = pl.pallas_call(
        kernel,
        out_shape=jax.ShapeDtypeStruct((out_rows, out_cols), jnp.float32),
        in_specs=[pl.BlockSpec(memory_space=pltpu.MemorySpace.VMEM)] * 5,
        out_specs=pl.BlockSpec(memory_space=pltpu.MemorySpace.VMEM),
    )

    @jax.jit
    def fwd(x_nchw, A, B, P, S):
        # NCHW -> NHWC -> [N*H, W*C] (channels merged into the lane axis)
        x2d = jnp.transpose(x_nchw, (0, 2, 3, 1)).reshape(N * H, W * img_ch)
        out2d = call(x2d, A, B, P, S)
        out = out2d.reshape(N, last['OH'], last['OW'], last['cout'])
        return jnp.transpose(out, (0, 3, 1, 2))        # NHWC -> NCHW

    def apply(x_nchw):
        return fwd(x_nchw, A_pack, B_pack, P_pack, S_pack)
    return apply


if __name__ == "__main__":
    key = jax.random.PRNGKey(0)
    k_param, k_x = jax.random.split(key)
    params = init_params(k_param, img_ch=2)

    # Input: NCHW, batch=2, img_ch=2, 16x16 spatial (divisible by 2^3 for the 3 stride-2 convs).
    gen = make_generator(params, img_ch=2, H=16, W=16, N=2)
    x = jax.random.normal(k_x, (2, 2, 16, 16), jnp.float32)

    out = gen(x)
    jax.block_until_ready(out)
    assert out.shape == (2, 1, 16, 16), out.shape
    print("KERNEL_OK")
</pallas_src>

<mosaic_0001>
module attributes {stable_mosaic.version = 11 : i64} {
  func.func @_generator_kernel(%arg0: memref<32x32xf32, #tpu.memory_space<vmem>>, %arg1: memref<280x32xf32, #tpu.memory_space<vmem>>, %arg2: memref<416x256xf32, #tpu.memory_space<vmem>>, %arg3: memref<192x64xf32, #tpu.memory_space<vmem>>, %arg4: memref<6x3x64xf32, #tpu.memory_space<vmem>>, %arg5: memref<32x16xf32, #tpu.memory_space<vmem>>) attributes {dimension_semantics = [], scalar_prefetch = 0 : i64, scratch_operands = 0 : i64, tpu.core_type = #tpu.core_type<tc>} {
    %c0 = arith.constant 0 : index
    %c0_0 = arith.constant 0 : index
    %0 = vector.load %arg0[%c0, %c0_0] : memref<32x32xf32, #tpu.memory_space<vmem>>, vector<32x32xf32>
    %c0_1 = arith.constant 0 : index
    %c0_2 = arith.constant 0 : index
    %1 = vector.load %arg1[%c0_1, %c0_2] : memref<280x32xf32, #tpu.memory_space<vmem>>, vector<64x32xf32>
    %cst = arith.constant dense<0.000000e+00> : vector<64x32xf32>
    %2 = tpu.matmul %1, %0, %cst {dimension_numbers = #tpu.dot_dimension_numbers<[1], [0], [0], [1], [0, 0, 1, 1], [], []>} : vector<64x32xf32>, vector<32x32xf32>, vector<64x32xf32> -> vector<64x32xf32>
    %c0_3 = arith.constant 0 : index
    %c0_4 = arith.constant 0 : index
    %3 = vector.load %arg2[%c0_3, %c0_4] : memref<416x256xf32, #tpu.memory_space<vmem>>, vector<32x256xf32>
    %cst_5 = arith.constant dense<0.000000e+00> : vector<64x256xf32>
    %4 = tpu.matmul %2, %3, %cst_5 {dimension_numbers = #tpu.dot_dimension_numbers<[1], [0], [0], [1], [0, 0, 1, 1], [], []>} : vector<64x32xf32>, vector<32x256xf32>, vector<64x256xf32> -> vector<64x256xf32>
    %5 = vector.extract_strided_slice %4 {offsets = [0, 0], sizes = [16, 64], strides = [1, 1]} : vector<64x256xf32> to vector<16x64xf32>
    %6 = vector.extract_strided_slice %4 {offsets = [16, 64], sizes = [16, 64], strides = [1, 1]} : vector<64x256xf32> to vector<16x64xf32>
    %7 = arith.addf %5, %6 : vector<16x64xf32>
    %8 = vector.extract_strided_slice %4 {offsets = [32, 128], sizes = [16, 64], strides = [1, 1]} : vector<64x256xf32> to vector<16x64xf32>
    %9 = arith.addf %7, %8 : vector<16x64xf32>
    %10 = vector.extract_strided_slice %4 {offsets = [48, 192], sizes = [16, 64], strides = [1, 1]} : vector<64x256xf32> to vector<16x64xf32>
    %11 = arith.addf %9, %10 : vector<16x64xf32>
    %c0_6 = arith.constant 0 : index
    %c0_7 = arith.constant 0 : index
    %c0_8 = arith.constant 0 : index
    %12 = vector.load %arg4[%c0_6, %c0_7, %c0_8] : memref<6x3x64xf32, #tpu.memory_space<vmem>>, vector<1x3x64xf32>
    %13 = vector.shape_cast %12 : vector<1x3x64xf32> to vector<3x64xf32>
    %14 = vector.extract_strided_slice %13 {offsets = [0, 0], sizes = [1, 64], strides = [1, 1]} : vector<3x64xf32> to vector<1x64xf32>
    %15 = vector.broadcast %14 : vector<1x64xf32> to vector<16x64xf32>
    %16 = arith.addf %11, %15 : vector<16x64xf32>
    %cst_9 = arith.constant 0.000000e+00 : f32
    %17 = vector.broadcast %cst_9 : f32 to vector<16x64xf32>
    %18 = arith.cmpf oge, %16, %17 : vector<16x64xf32>
    %cst_10 = arith.constant 2.000000e-01 : f32
    %19 = vector.broadcast %cst_10 : f32 to vector<16x64xf32>
    %20 = arith.mulf %19, %16 : vector<16x64xf32>
    %21 = arith.select %18, %16, %20 : vector<16x64xi1>, vector<16x64xf32>
    %c0_11 = arith.constant 0 : index
    %c0_12 = arith.constant 0 : index
    %22 = vector.load %arg3[%c0_11, %c0_12] : memref<192x64xf32, #tpu.memory_space<vmem>>, vector<64x64xf32>
    %cst_13 = arith.constant dense<0.000000e+00> : vector<64xf32>
    %23 = vector.multi_reduction <add>, %21, %cst_13 [0] : vector<16x64xf32> to vector<64xf32>
    %24 = vector.shape_cast %23 : vector<64xf32> to vector<1x64xf32>
    %25 = arith.mulf %21, %21 : vector<16x64xf32>
    %cst_14 = arith.constant dense<0.000000e+00> : vector<64xf32>
    %26 = vector.multi_reduction <add>, %25, %cst_14 [0] : vector<16x64xf32> to vector<64xf32>
    %27 = vector.shape_cast %26 : vector<64xf32> to vector<1x64xf32>
    %cst_15 = arith.constant dense<0.000000e+00> : vector<1x64xf32>
    %28 = tpu.matmul %24, %22, %cst_15 {dimension_numbers = #tpu.dot_dimension_numbers<[1], [0], [0], [1], [0, 0, 1, 1], [], []>} : vector<1x64xf32>, vector<64x64xf32>, vector<1x64xf32> -> vector<1x64xf32>
    %cst_16 = arith.constant 7.812500e-03 : f32
    %29 = vector.broadcast %cst_16 : f32 to vector<1x64xf32>
    %30 = arith.mulf %28, %29 : vector<1x64xf32>
    %cst_17 = arith.constant dense<0.000000e+00> : vector<1x64xf32>
    %31 = tpu.matmul %27, %22, %cst_17 {dimension_numbers = #tpu.dot_dimension_numbers<[1], [0], [0], [1], [0, 0, 1, 1], [], []>} : vector<1x64xf32>, vector<64x64xf32>, vector<1x64xf32> -> vector<1x64xf32>
    %cst_18 = arith.constant 7.812500e-03 : f32
    %32 = vector.broadcast %cst_18 : f32 to vector<1x64xf32>
    %33 = arith.mulf %31, %32 : vector<1x64xf32>
    %34 = arith.mulf %30, %30 : vector<1x64xf32>
    %35 = arith.subf %33, %34 : vector<1x64xf32>
    %36 = vector.extract_strided_slice %13 {offsets = [1, 0], sizes = [1, 64], strides = [1, 1]} : vector<3x64xf32> to vector<1x64xf32>
    %37 = vector.extract_strided_slice %13 {offsets = [2, 0], sizes = [1, 64], strides = [1, 1]} : vector<3x64xf32> to vector<1x64xf32>
    %38 = vector.broadcast %30 : vector<1x64xf32> to vector<16x64xf32>
    %39 = arith.subf %21, %38 : vector<16x64xf32>
    %cst_19 = arith.constant 9.99999974E-6 : f32
    %40 = vector.broadcast %cst_19 : f32 to vector<1x64xf32>
    %41 = arith.addf %35, %40 : vector<1x64xf32>
    %42 = math.rsqrt %41 : vector<1x64xf32>
    %43 = arith.mulf %42, %36 : vector<1x64xf32>
    %44 = vector.broadcast %43 : vector<1x64xf32> to vector<16x64xf32>
    %45 = arith.mulf %39, %44 : vector<16x64xf32>
    %46 = vector.broadcast %37 : vector<1x64xf32> to vector<16x64xf32>
    %47 = arith.addf %45, %46 : vector<16x64xf32>
    %c64 = arith.constant 64 : index
    %c0_20 = arith.constant 0 : index
    %48 = vector.load %arg1[%c64, %c0_20] : memref<280x32xf32, #tpu.memory_space<vmem>>, vector<32x16xf32>
    %cst_21 = arith.constant dense<0.000000e+00> : vector<32x64xf32>
    %49 = tpu.matmul %48, %47, %cst_21 {dimension_numbers = #tpu.dot_dimension_numbers<[1], [0], [0], [1], [0, 0, 1, 1], [], []>} : vector<32x16xf32>, vector<16x64xf32>, vector<32x64xf32> -> vector<32x64xf32>
    %c32 = arith.constant 32 : index
    %c0_22 = arith.constant 0 : index
    %50 = vector.load %arg2[%c32, %c0_22] : memref<416x256xf32, #tpu.memory_space<vmem>>, vector<64x256xf32>
    %cst_23 = arith.constant dense<0.000000e+00> : vector<32x256xf32>
    %51 = tpu.matmul %49, %50, %cst_23 {dimension_numbers = #tpu.dot_dimension_numbers<[1], [0], [0], [1], [0, 0, 1, 1], [], []>} : vector<32x64xf32>, vector<64x256xf32>, vector<32x256xf32> -> vector<32x256xf32>
    %52 = vector.extract_strided_slice %51 {offsets = [0, 0], sizes = [8, 64], strides = [1, 1]} : vector<32x256xf32> to vector<8x64xf32>
    %53 = vector.extract_strided_slice %51 {offsets = [8, 64], sizes = [8, 64], strides = [1, 1]} : vector<32x256xf32> to vector<8x64xf32>
    %54 = arith.addf %52, %53 : vector<8x64xf32>
    %55 = vector.extract_strided_slice %51 {offsets = [16, 128], sizes = [8, 64], strides = [1, 1]} : vector<32x256xf32> to vector<8x64xf32>
    %56 = arith.addf %54, %55 : vector<8x64xf32>
    %57 = vector.extract_strided_slice %51 {offsets = [24, 192], sizes = [8, 64], strides = [1, 1]} : vector<32x256xf32> to vector<8x64xf32>
    %58 = arith.addf %56, %57 : vector<8x64xf32>
    %c1 = arith.constant 1 : index
    %c0_24 = arith.constant 0 : index
    %c0_25 = arith.constant 0 : index
    %59 = vector.load %arg4[%c1, %c0_24, %c0_25] : memref<6x3x64xf32, #tpu.memory_space<vmem>>, vector<1x3x64xf32>
    %60 = vector.shape_cast %59 : vector<1x3x64xf32> to vector<3x64xf32>
    %61 = vector.extract_strided_slice %60 {offsets = [0, 0], sizes = [1, 64], strides = [1, 1]} : vector<3x64xf32> to vector<1x64xf32>
    %62 = vector.broadcast %61 : vector<1x64xf32> to vector<8x64xf32>
    %63 = arith.addf %58, %62 : vector<8x64xf32>
    %cst_26 = arith.constant 0.000000e+00 : f32
    %64 = vector.broadcast %cst_26 : f32 to vector<8x64xf32>
    %65 = arith.cmpf oge, %63, %64 : vector<8x64xf32>
    %cst_27 = arith.constant 2.000000e-01 : f32
    %66 = vector.broadcast %cst_27 : f32 to vector<8x64xf32>
    %67 = arith.mulf %66, %63 : vector<8x64xf32>
    %68 = arith.select %65, %63, %67 : vector<8x64xi1>, vector<8x64xf32>
    %c64_28 = arith.constant 64 : index
    %c0_29 = arith.constant 0 : index
    %69 = vector.load %arg3[%c64_28, %c0_29] : memref<192x64xf32, #tpu.memory_space<vmem>>, vector<64x64xf32>
    %cst_30 = arith.constant dense<0.000000e+00> : vector<64xf32>
    %70 = vector.multi_reduction <add>, %68, %cst_30 [0] : vector<8x64xf32> to vector<64xf32>
    %71 = vector.shape_cast %70 : vector<64xf32> to vector<1x64xf32>
    %72 = arith.mulf %68, %68 : vector<8x64xf32>
    %cst_31 = arith.constant dense<0.000000e+00> : vector<64xf32>
    %73 = vector.multi_reduction <add>, %72, %cst_31 [0] : vector<8x64xf32> to vector<64xf32>
    %74 = vector.shape_cast %73 : vector<64xf32> to vector<1x64xf32>
    %cst_32 = arith.constant dense<0.000000e+00> : vector<1x64xf32>
    %75 = tpu.matmul %71, %69, %cst_32 {dimension_numbers = #tpu.dot_dimension_numbers<[1], [0], [0], [1], [0, 0, 1, 1], [], []>} : vector<1x64xf32>, vector<64x64xf32>, vector<1x64xf32> -> vector<1x64xf32>
    %cst_33 = arith.constant 3.125000e-02 : f32
    %76 = vector.broadcast %cst_33 : f32 to vector<1x64xf32>
    %77 = arith.mulf %75, %76 : vector<1x64xf32>
    %cst_34 = arith.constant dense<0.000000e+00> : vector<1x64xf32>
    %78 = tpu.matmul %74, %69, %cst_34 {dimension_numbers = #tpu.dot_dimension_numbers<[1], [0], [0], [1], [0, 0, 1, 1], [], []>} : vector<1x64xf32>, vector<64x64xf32>, vector<1x64xf32> -> vector<1x64xf32>
    %cst_35 = arith.constant 3.125000e-02 : f32
    %79 = vector.broadcast %cst_35 : f32 to vector<1x64xf32>
    %80 = arith.mulf %78, %79 : vector<1x64xf32>
    %81 = arith.mulf %77, %77 : vector<1x64xf32>
    %82 = arith.subf %80, %81 : vector<1x64xf32>
    %83 = vector.extract_strided_slice %60 {offsets = [1, 0], sizes = [1, 64], strides = [1, 1]} : vector<3x64xf32> to vector<1x64xf32>
    %84 = vector.extract_strided_slice %60 {offsets = [2, 0], sizes = [1, 64], strides = [1, 1]} : vector<3x64xf32> to vector<1x64xf32>
    %85 = vector.broadcast %77 : vector<1x64xf32> to vector<8x64xf32>
    %86 = arith.subf %68, %85 : vector<8x64xf32>
    %cst_36 = arith.constant 9.99999974E-6 : f32
    %87 = vector.broadcast %cst_36 : f32 to vector<1x64xf32>
    %88 = arith.addf %82, %87 : vector<1x64xf32>
    %89 = math.rsqrt %88 : vector<1x64xf32>
    %90 = arith.mulf %89, %83 : vector<1x64xf32>
    %91 = vector.broadcast %90 : vector<1x64xf32> to vector<8x64xf32>
    %92 = arith.mulf %86, %91 : vector<8x64xf32>
    %93 = vector.broadcast %84 : vector<1x64xf32> to vector<8x64xf32>
    %94 = arith.addf %92, %93 : vector<8x64xf32>
    %c96 = arith.constant 96 : index
    %c0_37 = arith.constant 0 : index
    %95 = vector.load %arg1[%c96, %c0_37] : memref<280x32xf32, #tpu.memory_space<vmem>>, vector<16x8xf32>
    %cst_38 = arith.constant dense<0.000000e+00> : vector<16x64xf32>
    %96 = tpu.matmul %95, %94, %cst_38 {dimension_numbers = #tpu.dot_dimension_numbers<[1], [0], [0], [1], [0, 0, 1, 1], [], []>} : vector<16x8xf32>, vector<8x64xf32>, vector<16x64xf32> -> vector<16x64xf32>
    %c96_39 = arith.constant 96 : index
    %c0_40 = arith.constant 0 : index
    %97 = vector.load %arg2[%c96_39, %c0_40] : memref<416x256xf32, #tpu.memory_space<vmem>>, vector<64x256xf32>
    %cst_41 = arith.constant dense<0.000000e+00> : vector<16x256xf32>
    %98 = tpu.matmul %96, %97, %cst_41 {dimension_numbers = #tpu.dot_dimension_numbers<[1], [0], [0], [1], [0, 0, 1, 1], [], []>} : vector<16x64xf32>, vector<64x256xf32>, vector<16x256xf32> -> vector<16x256xf32>
    %99 = vector.extract_strided_slice %98 {offsets = [0, 0], sizes = [4, 64], strides = [1, 1]} : vector<16x256xf32> to vector<4x64xf32>
    %100 = vector.extract_strided_slice %98 {offsets = [4, 64], sizes = [4, 64], strides = [1, 1]} : vector<16x256xf32> to vector<4x64xf32>
    %101 = arith.addf %99, %100 : vector<4x64xf32>
    %102 = vector.extract_strided_slice %98 {offsets = [8, 128], sizes = [4, 64], strides = [1, 1]} : vector<16x256xf32> to vector<4x64xf32>
    %103 = arith.addf %101, %102 : vector<4x64xf32>
    %104 = vector.extract_strided_slice %98 {offsets = [12, 192], sizes = [4, 64], strides = [1, 1]} : vector<16x256xf32> to vector<4x64xf32>
    %105 = arith.addf %103, %104 : vector<4x64xf32>
    %c2 = arith.constant 2 : index
    %c0_42 = arith.constant 0 : index
    %c0_43 = arith.constant 0 : index
    %106 = vector.load %arg4[%c2, %c0_42, %c0_43] : memref<6x3x64xf32, #tpu.memory_space<vmem>>, vector<1x3x64xf32>
    %107 = vector.shape_cast %106 : vector<1x3x64xf32> to vector<3x64xf32>
    %108 = vector.extract_strided_slice %107 {offsets = [0, 0], sizes = [1, 64], strides = [1, 1]} : vector<3x64xf32> to vector<1x64xf32>
    %109 = vector.broadcast %108 : vector<1x64xf32> to vector<4x64xf32>
    %110 = arith.addf %105, %109 : vector<4x64xf32>
    %cst_44 = arith.constant 0.000000e+00 : f32
    %111 = vector.broadcast %cst_44 : f32 to vector<4x64xf32>
    %112 = arith.cmpf oge, %110, %111 : vector<4x64xf32>
    %cst_45 = arith.constant 2.000000e-01 : f32
    %113 = vector.broadcast %cst_45 : f32 to vector<4x64xf32>
    %114 = arith.mulf %113, %110 : vector<4x64xf32>
    %115 = arith.select %112, %110, %114 : vector<4x64xi1>, vector<4x64xf32>
    %c128 = arith.constant 128 : index
    %c0_46 = arith.constant 0 : index
    %116 = vector.load %arg3[%c128, %c0_46] : memref<192x64xf32, #tpu.memory_space<vmem>>, vector<64x64xf32>
    %cst_47 = arith.constant dense<0.000000e+00> : vector<64xf32>
    %117 = vector.multi_reduction <add>, %115, %cst_47 [0] : vector<4x64xf32> to vector<64xf32>
    %118 = vector.shape_cast %117 : vector<64xf32> to vector<1x64xf32>
    %119 = arith.mulf %115, %115 : vector<4x64xf32>
    %cst_48 = arith.constant dense<0.000000e+00> : vector<64xf32>
    %120 = vector.multi_reduction <add>, %119, %cst_48 [0] : vector<4x64xf32> to vector<64xf32>
    %121 = vector.shape_cast %120 : vector<64xf32> to vector<1x64xf32>
    %cst_49 = arith.constant dense<0.000000e+00> : vector<1x64xf32>
    %122 = tpu.matmul %118, %116, %cst_49 {dimension_numbers = #tpu.dot_dimension_numbers<[1], [0], [0], [1], [0, 0, 1, 1], [], []>} : vector<1x64xf32>, vector<64x64xf32>, vector<1x64xf32> -> vector<1x64xf32>
    %cst_50 = arith.constant 1.250000e-01 : f32
    %123 = vector.broadcast %cst_50 : f32 to vector<1x64xf32>
    %124 = arith.mulf %122, %123 : vector<1x64xf32>
    %cst_51 = arith.constant dense<0.000000e+00> : vector<1x64xf32>
    %125 = tpu.matmul %121, %116, %cst_51 {dimension_numbers = #tpu.dot_dimension_numbers<[1], [0], [0], [1], [0, 0, 1, 1], [], []>} : vector<1x64xf32>, vector<64x64xf32>, vector<1x64xf32> -> vector<1x64xf32>
    %cst_52 = arith.constant 1.250000e-01 : f32
    %126 = vector.broadcast %cst_52 : f32 to vector<1x64xf32>
    %127 = arith.mulf %125, %126 : vector<1x64xf32>
    %128 = arith.mulf %124, %124 : vector<1x64xf32>
    %129 = arith.subf %127, %128 : vector<1x64xf32>
    %130 = vector.extract_strided_slice %107 {offsets = [1, 0], sizes = [1, 64], strides = [1, 1]} : vector<3x64xf32> to vector<1x64xf32>
    %131 = vector.extract_strided_slice %107 {offsets = [2, 0], sizes = [1, 64], strides = [1, 1]} : vector<3x64xf32> to vector<1x64xf32>
    %132 = vector.broadcast %124 : vector<1x64xf32> to vector<4x64xf32>
    %133 = arith.subf %115, %132 : vector<4x64xf32>
    %cst_53 = arith.constant 9.99999974E-6 : f32
    %134 = vector.broadcast %cst_53 : f32 to vector<1x64xf32>
    %135 = arith.addf %129, %134 : vector<1x64xf32>
    %136 = math.rsqrt %135 : vector<1x64xf32>
    %137 = arith.mulf %136, %130 : vector<1x64xf32>
    %138 = vector.broadcast %137 : vector<1x64xf32> to vector<4x64xf32>
    %139 = arith.mulf %133, %138 : vector<4x64xf32>
    %140 = vector.broadcast %131 : vector<1x64xf32> to vector<4x64xf32>
    %141 = arith.addf %139, %140 : vector<4x64xf32>
    %cst_54 = arith.constant 0.000000e+00 : f32
    %142 = vector.broadcast %cst_54 : f32 to vector<4x64xf32>
    %143 = arith.maximumf %141, %142 : vector<4x64xf32>
    %c112 = arith.constant 112 : index
    %c0_55 = arith.constant 0 : index
    %144 = vector.load %arg1[%c112, %c0_55] : memref<280x32xf32, #tpu.memory_space<vmem>>, vector<24x4xf32>
    %cst_56 = arith.constant dense<0.000000e+00> : vector<24x64xf32>
    %145 = tpu.matmul %144, %143, %cst_56 {dimension_numbers = #tpu.dot_dimension_numbers<[1], [0], [0], [1], [0, 0, 1, 1], [], []>} : vector<24x4xf32>, vector<4x64xf32>, vector<24x64xf32> -> vector<24x64xf32>
    %c160 = arith.constant 160 : index
    %c0_57 = arith.constant 0 : index
    %146 = vector.load %arg2[%c160, %c0_57] : memref<416x256xf32, #tpu.memory_space<vmem>>, vector<64x192xf32>
    %cst_58 = arith.constant dense<0.000000e+00> : vector<24x192xf32>
    %147 = tpu.matmul %145, %146, %cst_58 {dimension_numbers = #tpu.dot_dimension_numbers<[1], [0], [0], [1], [0, 0, 1, 1], [], []>} : vector<24x64xf32>, vector<64x192xf32>, vector<24x192xf32> -> vector<24x192xf32>
    %148 = vector.extract_strided_slice %147 {offsets = [0, 0], sizes = [8, 64], strides = [1, 1]} : vector<24x192xf32> to vector<8x64xf32>
    %149 = vector.extract_strided_slice %147 {offsets = [8, 64], sizes = [8, 64], strides = [1, 1]} : vector<24x192xf32> to vector<8x64xf32>
    %150 = arith.addf %148, %149 : vector<8x64xf32>
    %151 = vector.extract_strided_slice %147 {offsets = [16, 128], sizes = [8, 64], strides = [1, 1]} : vector<24x192xf32> to vector<8x64xf32>
    %152 = arith.addf %150, %151 : vector<8x64xf32>
    %c3 = arith.constant 3 : index
    %c0_59 = arith.constant 0 : index
    %c0_60 = arith.constant 0 : index
    %153 = vector.load %arg4[%c3, %c0_59, %c0_60] : memref<6x3x64xf32, #tpu.memory_space<vmem>>, vector<1x3x64xf32>
    %154 = vector.shape_cast %153 : vector<1x3x64xf32> to vector<3x64xf32>
    %155 = vector.extract_strided_slice %154 {offsets = [0, 0], sizes = [1, 64], strides = [1, 1]} : vector<3x64xf32> to vector<1x64xf32>
    %156 = vector.broadcast %155 : vector<1x64xf32> to vector<8x64xf32>
    %157 = arith.addf %152, %156 : vector<8x64xf32>
    %c64_61 = arith.constant 64 : index
    %c0_62 = arith.constant 0 : index
    %158 = vector.load %arg3[%c64_61, %c0_62] : memref<192x64xf32, #tpu.memory_space<vmem>>, vector<64x64xf32>
    %cst_63 = arith.constant dense<0.000000e+00> : vector<64xf32>
    %159 = vector.multi_reduction <add>, %157, %cst_63 [0] : vector<8x64xf32> to vector<64xf32>
    %160 = vector.shape_cast %159 : vector<64xf32> to vector<1x64xf32>
    %161 = arith.mulf %157, %157 : vector<8x64xf32>
    %cst_64 = arith.constant dense<0.000000e+00> : vector<64xf32>
    %162 = vector.multi_reduction <add>, %161, %cst_64 [0] : vector<8x64xf32> to vector<64xf32>
    %163 = vector.shape_cast %162 : vector<64xf32> to vector<1x64xf32>
    %cst_65 = arith.constant dense<0.000000e+00> : vector<1x64xf32>
    %164 = tpu.matmul %160, %158, %cst_65 {dimension_numbers = #tpu.dot_dimension_numbers<[1], [0], [0], [1], [0, 0, 1, 1], [], []>} : vector<1x64xf32>, vector<64x64xf32>, vector<1x64xf32> -> vector<1x64xf32>
    %cst_66 = arith.constant 3.125000e-02 : f32
    %165 = vector.broadcast %cst_66 : f32 to vector<1x64xf32>
    %166 = arith.mulf %164, %165 : vector<1x64xf32>
    %cst_67 = arith.constant dense<0.000000e+00> : vector<1x64xf32>
    %167 = tpu.matmul %163, %158, %cst_67 {dimension_numbers = #tpu.dot_dimension_numbers<[1], [0], [0], [1], [0, 0, 1, 1], [], []>} : vector<1x64xf32>, vector<64x64xf32>, vector<1x64xf32> -> vector<1x64xf32>
    %cst_68 = arith.constant 3.125000e-02 : f32
    %168 = vector.broadcast %cst_68 : f32 to vector<1x64xf32>
    %169 = arith.mulf %167, %168 : vector<1x64xf32>
    %170 = arith.mulf %166, %166 : vector<1x64xf32>
    %171 = arith.subf %169, %170 : vector<1x64xf32>
    %172 = vector.extract_strided_slice %154 {offsets = [1, 0], sizes = [1, 64], strides = [1, 1]} : vector<3x64xf32> to vector<1x64xf32>
    %173 = vector.extract_strided_slice %154 {offsets = [2, 0], sizes = [1, 64], strides = [1, 1]} : vector<3x64xf32> to vector<1x64xf32>
    %174 = vector.broadcast %166 : vector<1x64xf32> to vector<8x64xf32>
    %175 = arith.subf %157, %174 : vector<8x64xf32>
    %cst_69 = arith.constant 9.99999974E-6 : f32
    %176 = vector.broadcast %cst_69 : f32 to vector<1x64xf32>
    %177 = arith.addf %171, %176 : vector<1x64xf32>
    %178 = math.rsqrt %177 : vector<1x64xf32>
    %179 = arith.mulf %178, %172 : vector<1x64xf32>
    %180 = vector.broadcast %179 : vector<1x64xf32> to vector<8x64xf32>
    %181 = arith.mulf %175, %180 : vector<8x64xf32>
    %182 = vector.broadcast %173 : vector<1x64xf32> to vector<8x64xf32>
    %183 = arith.addf %181, %182 : vector<8x64xf32>
    %cst_70 = arith.constant 0.000000e+00 : f32
    %184 = vector.broadcast %cst_70 : f32 to vector<8x64xf32>
    %185 = arith.maximumf %183, %184 : vector<8x64xf32>
    %c136 = arith.constant 136 : index
    %c0_71 = arith.constant 0 : index
    %186 = vector.load %arg1[%c136, %c0_71] : memref<280x32xf32, #tpu.memory_space<vmem>>, vector<48x8xf32>
    %cst_72 = arith.constant dense<0.000000e+00> : vector<48x64xf32>
    %187 = tpu.matmul %186, %185, %cst_72 {dimension_numbers = #tpu.dot_dimension_numbers<[1], [0], [0], [1], [0, 0, 1, 1], [], []>} : vector<48x8xf32>, vector<8x64xf32>, vector<48x64xf32> -> vector<48x64xf32>
    %c224 = arith.constant 224 : index
    %c0_73 = arith.constant 0 : index
    %188 = vector.load %arg2[%c224, %c0_73] : memref<416x256xf32, #tpu.memory_space<vmem>>, vector<64x192xf32>
    %cst_74 = arith.constant dense<0.000000e+00> : vector<48x192xf32>
    %189 = tpu.matmul %187, %188, %cst_74 {dimension_numbers = #tpu.dot_dimension_numbers<[1], [0], [0], [1], [0, 0, 1, 1], [], []>} : vector<48x64xf32>, vector<64x192xf32>, vector<48x192xf32> -> vector<48x192xf32>
    %190 = vector.extract_strided_slice %189 {offsets = [0, 0], sizes = [16, 64], strides = [1, 1]} : vector<48x192xf32> to vector<16x64xf32>
    %191 = vector.extract_strided_slice %189 {offsets = [16, 64], sizes = [16, 64], strides = [1, 1]} : vector<48x192xf32> to vector<16x64xf32>
    %192 = arith.addf %190, %191 : vector<16x64xf32>
    %193 = vector.extract_strided_slice %189 {offsets = [32, 128], sizes = [16, 64], strides = [1, 1]} : vector<48x192xf32> to vector<16x64xf32>
    %194 = arith.addf %192, %193 : vector<16x64xf32>
    %cst_75 = arith.constant 0.000000e+00 : f32
    %195 = vector.broadcast %cst_75 : f32 to vector<8x64xf32>
    %196 = arith.maximumf %94, %195 : vector<8x64xf32>
    %c136_76 = arith.constant 136 : index
    %c0_77 = arith.constant 0 : index
    %197 = vector.load %arg1[%c136_76, %c0_77] : memref<280x32xf32, #tpu.memory_space<vmem>>, vector<48x8xf32>
    %cst_78 = arith.constant dense<0.000000e+00> : vector<48x64xf32>
    %198 = tpu.matmul %197, %196, %cst_78 {dimension_numbers = #tpu.dot_dimension_numbers<[1], [0], [0], [1], [0, 0, 1, 1], [], []>} : vector<48x8xf32>, vector<8x64xf32>, vector<48x64xf32> -> vector<48x64xf32>
    %c288 = arith.constant 288 : index
    %c0_79 = arith.constant 0 : index
    %199 = vector.load %arg2[%c288, %c0_79] : memref<416x256xf32, #tpu.memory_space<vmem>>, vector<64x192xf32>
    %cst_80 = arith.constant dense<0.000000e+00> : vector<48x192xf32>
    %200 = tpu.matmul %198, %199, %cst_80 {dimension_numbers = #tpu.dot_dimension_numbers<[1], [0], [0], [1], [0, 0, 1, 1], [], []>} : vector<48x64xf32>, vector<64x192xf32>, vector<48x192xf32> -> vector<48x192xf32>
    %201 = vector.extract_strided_slice %200 {offsets = [0, 0], sizes = [16, 64], strides = [1, 1]} : vector<48x192xf32> to vector<16x64xf32>
    %202 = vector.extract_strided_slice %200 {offsets = [16, 64], sizes = [16, 64], strides = [1, 1]} : vector<48x192xf32> to vector<16x64xf32>
    %203 = arith.addf %201, %202 : vector<16x64xf32>
    %204 = vector.extract_strided_slice %200 {offsets = [32, 128], sizes = [16, 64], strides = [1, 1]} : vector<48x192xf32> to vector<16x64xf32>
    %205 = arith.addf %203, %204 : vector<16x64xf32>
    %206 = arith.addf %194, %205 : vector<16x64xf32>
    %c4 = arith.constant 4 : index
    %c0_81 = arith.constant 0 : index
    %c0_82 = arith.constant 0 : index
    %207 = vector.load %arg4[%c4, %c0_81, %c0_82] : memref<6x3x64xf32, #tpu.memory_space<vmem>>, vector<1x3x64xf32>
    %208 = vector.shape_cast %207 : vector<1x3x64xf32> to vector<3x64xf32>
    %209 = vector.extract_strided_slice %208 {offsets = [0, 0], sizes = [1, 64], strides = [1, 1]} : vector<3x64xf32> to vector<1x64xf32>
    %210 = vector.broadcast %209 : vector<1x64xf32> to vector<16x64xf32>
    %211 = arith.addf %206, %210 : vector<16x64xf32>
    %c0_83 = arith.constant 0 : index
    %c0_84 = arith.constant 0 : index
    %212 = vector.load %arg3[%c0_83, %c0_84] : memref<192x64xf32, #tpu.memory_space<vmem>>, vector<64x64xf32>
    %cst_85 = arith.constant dense<0.000000e+00> : vector<64xf32>
    %213 = vector.multi_reduction <add>, %211, %cst_85 [0] : vector<16x64xf32> to vector<64xf32>
    %214 = vector.shape_cast %213 : vector<64xf32> to vector<1x64xf32>
    %215 = arith.mulf %211, %211 : vector<16x64xf32>
    %cst_86 = arith.constant dense<0.000000e+00> : vector<64xf32>
    %216 = vector.multi_reduction <add>, %215, %cst_86 [0] : vector<16x64xf32> to vector<64xf32>
    %217 = vector.shape_cast %216 : vector<64xf32> to vector<1x64xf32>
    %cst_87 = arith.constant dense<0.000000e+00> : vector<1x64xf32>
    %218 = tpu.matmul %214, %212, %cst_87 {dimension_numbers = #tpu.dot_dimension_numbers<[1], [0], [0], [1], [0, 0, 1, 1], [], []>} : vector<1x64xf32>, vector<64x64xf32>, vector<1x64xf32> -> vector<1x64xf32>
    %cst_88 = arith.constant 7.812500e-03 : f32
    %219 = vector.broadcast %cst_88 : f32 to vector<1x64xf32>
    %220 = arith.mulf %218, %219 : vector<1x64xf32>
    %cst_89 = arith.constant dense<0.000000e+00> : vector<1x64xf32>
    %221 = tpu.matmul %217, %212, %cst_89 {dimension_numbers = #tpu.dot_dimension_numbers<[1], [0], [0], [1], [0, 0, 1, 1], [], []>} : vector<1x64xf32>, vector<64x64xf32>, vector<1x64xf32> -> vector<1x64xf32>
    %cst_90 = arith.constant 7.812500e-03 : f32
    %222 = vector.broadcast %cst_90 : f32 to vector<1x64xf32>
    %223 = arith.mulf %221, %222 : vector<1x64xf32>
    %224 = arith.mulf %220, %220 : vector<1x64xf32>
    %225 = arith.subf %223, %224 : vector<1x64xf32>
    %226 = vector.extract_strided_slice %208 {offsets = [1, 0], sizes = [1, 64], strides = [1, 1]} : vector<3x64xf32> to vector<1x64xf32>
    %227 = vector.extract_strided_slice %208 {offsets = [2, 0], sizes = [1, 64], strides = [1, 1]} : vector<3x64xf32> to vector<1x64xf32>
    %228 = vector.broadcast %220 : vector<1x64xf32> to vector<16x64xf32>
    %229 = arith.subf %211, %228 : vector<16x64xf32>
    %cst_91 = arith.constant 9.99999974E-6 : f32
    %230 = vector.broadcast %cst_91 : f32 to vector<1x64xf32>
    %231 = arith.addf %225, %230 : vector<1x64xf32>
    %232 = math.rsqrt %231 : vector<1x64xf32>
    %233 = arith.mulf %232, %226 : vector<1x64xf32>
    %234 = vector.broadcast %233 : vector<1x64xf32> to vector<16x64xf32>
    %235 = arith.mulf %229, %234 : vector<16x64xf32>
    %236 = vector.broadcast %227 : vector<1x64xf32> to vector<16x64xf32>
    %237 = arith.addf %235, %236 : vector<16x64xf32>
    %cst_92 = arith.constant 0.000000e+00 : f32
    %238 = vector.broadcast %cst_92 : f32 to vector<16x64xf32>
    %239 = arith.maximumf %237, %238 : vector<16x64xf32>
    %c184 = arith.constant 184 : index
    %c0_93 = arith.constant 0 : index
    %240 = vector.load %arg1[%c184, %c0_93] : memref<280x32xf32, #tpu.memory_space<vmem>>, vector<96x16xf32>
    %cst_94 = arith.constant dense<0.000000e+00> : vector<96x64xf32>
    %241 = tpu.matmul %240, %239, %cst_94 {dimension_numbers = #tpu.dot_dimension_numbers<[1], [0], [0], [1], [0, 0, 1, 1], [], []>} : vector<96x16xf32>, vector<16x64xf32>, vector<96x64xf32> -> vector<96x64xf32>
    %c352 = arith.constant 352 : index
    %c0_95 = arith.constant 0 : index
    %242 = vector.load %arg2[%c352, %c0_95] : memref<416x256xf32, #tpu.memory_space<vmem>>, vector<64x48xf32>
    %cst_96 = arith.constant dense<0.000000e+00> : vector<96x48xf32>
    %243 = tpu.matmul %241, %242, %cst_96 {dimension_numbers = #tpu.dot_dimension_numbers<[1], [0], [0], [1], [0, 0, 1, 1], [], []>} : vector<96x64xf32>, vector<64x48xf32>, vector<96x48xf32> -> vector<96x48xf32>
    %244 = vector.extract_strided_slice %243 {offsets = [0, 0], sizes = [32, 16], strides = [1, 1]} : vector<96x48xf32> to vector<32x16xf32>
    %245 = vector.extract_strided_slice %243 {offsets = [32, 16], sizes = [32, 16], strides = [1, 1]} : vector<96x48xf32> to vector<32x16xf32>
    %246 = arith.addf %244, %245 : vector<32x16xf32>
    %247 = vector.extract_strided_slice %243 {offsets = [64, 32], sizes = [32, 16], strides = [1, 1]} : vector<96x48xf32> to vector<32x16xf32>
    %248 = arith.addf %246, %247 : vector<32x16xf32>
    %c5 = arith.constant 5 : index
    %c0_97 = arith.constant 0 : index
    %c0_98 = arith.constant 0 : index
    %249 = vector.load %arg4[%c5, %c0_97, %c0_98] : memref<6x3x64xf32, #tpu.memory_space<vmem>>, vector<1x3x64xf32>
    %250 = vector.shape_cast %249 : vector<1x3x64xf32> to vector<3x64xf32>
    %251 = vector.extract_strided_slice %250 {offsets = [0, 0], sizes = [1, 16], strides = [1, 1]} : vector<3x64xf32> to vector<1x16xf32>
    %252 = vector.broadcast %251 : vector<1x16xf32> to vector<32x16xf32>
    %253 = arith.addf %248, %252 : vector<32x16xf32>
    %c0_99 = arith.constant 0 : index
    %c0_100 = arith.constant 0 : index
    %254 = vector.load %arg5[%c0_99, %c0_100] : memref<32x16xf32, #tpu.memory_space<vmem>>, vector<32x16xf32>
    tpu.vector_store %arg5[%c0_99, %c0_100], %253 {strides = array<i32>} : memref<32x16xf32, #tpu.memory_space<vmem>>, vector<32x16xf32>,
    return
  }
}

</mosaic_0001>

<bundles_post_ra>
// kernel: fwd.1
= control target key start
LH: loop header
LB: loop body
LE: loop exit
PB: predicated region body
PF: predicated region fallthrough
CT: control target
= control target key end

     0   :  { %vm33_vm0 = vcmask 261120   ;;  %s4640_s0 = inlined_call_operand.vmem [shape: f32[32,32], index: 0, kind: input, shape index: {}]   ;;  %s4641_s1 = inlined_call_operand.vmem [shape: f32[280,32], index: 1, kind: input, shape index: {}]   ;;  %s4642_s2 = inlined_call_operand.vmem [shape: f32[416,256], index: 2, kind: input, shape index: {}]   ;;  %s4643_s3 = inlined_call_operand.vmem [shape: f32[192,64], index: 3, kind: input, shape index: {}]   ;;  %s4644_s4 = inlined_call_operand.vmem [shape: f32[6,3,64], index: 4, kind: input, shape index: {}]   ;;  %s4645_s5 = inlined_call_operand.hbm [shape: f32[32,16], index: 5, kind: output, shape index: {}]  }
   0x1   :  { %v21_v0 = vld [vmem:[%s4640_s0] sm:$0xff]  ;;  %v22_v1 = vld [vmem:[%s4640_s0 + $0x8] sm:$0xff]  ;;  %v23_v2 = vld [vmem:[%s4640_s0 + $0x10] sm:$0xff] }
   0x2   :  { %v3460_v3 = vpack.c.bf16 %v22_v1, %v21_v0  ;;  %v24_v4 = vld [vmem:[%s4640_s0 + $0x18] sm:$0xff]  ;;  %v25_v5 = vld [vmem:[%s4641_s1] sm:$0xff]  ;;  %v164_v7 = vld [vmem:[%s4642_s2 + $0x8] sm:$0xff] }
   0x3   :  { %v3464_v6 = vpack.c.bf16 %v24_v4, %v23_v2  ;;  %3154 = vmatprep.mubr.msk.f32.mxu0 %vm33_vm0, %v25_v5  ;;  %v166_v8 = vld [vmem:[%s4642_s2 + $0x18] sm:$0xff]  ;;  %v163_v9 = vld [vmem:[%s4642_s2] sm:$0xff]  ;;  %v165_v11 = vld [vmem:[%s4642_s2 + $0x10] sm:$0xff] }
   0x4   :  { %3461 = vmatprep.subr.bf16.mxu0 %v3460_v3  ;;  %v3468_v10 = vpack.c.bf16 %v166_v8, %v164_v7  ;;  %v168_v12 = vld [vmem:[%s4642_s2 + $0x28] sm:$0xff]  ;;  %v170_v13 = vld [vmem:[%s4642_s2 + $0x38] sm:$0xff]  ;;  %v3470_v14 = vpack.c.bf16 %v165_v11, %v163_v9 }
   0x5   :  { %3463 = vmatpush3.bf16.msra.mxu0 %v3460_v3 }
   0x6   :  { %3465 = vmatprep.subr.bf16.mxu0 %v3464_v6 }
   0x7   :  { %10 = vsyncpa [#allocation3], 0  ;;  %v3472_v15 = vpack.c.bf16 %v170_v13, %v168_v12  ;;  %3700 = vmatprep.subr.bf16.mxu1 %v3468_v10  ;;  %v26_v16 = vld [vmem:[%s4641_s1 + $0x8] sm:$0xff]  ;;  %v167_v17 = vld [vmem:[%s4642_s2 + $0x20] sm:$0xff]  ;;  %v3747_v26 = vmov 0.0   ;;  %s3748_s7 = smov 64   ;;  %v323_v0 = vlaneseq }
   0x8   :  { %v169_v18 = vld [vmem:[%s4642_s2 + $0x30] sm:$0xff]  ;;  %3702 = vmatpush1.bf16.msra.mxu1 %v3470_v14  ;;  %v28_v21 = vld [vmem:[%s4641_s1 + $0x18] sm:$0xff]  ;;  %v29_v22 = vld [vmem:[%s4641_s1 + $0x20] sm:$0xff]  ;;  %279 = vmatprep.mubr.f32.mxu1 %v3747_v26  ;;  %v3749_v50 = vmov 0.0|0.0   ;;  %vm3750_vm1 = vmmov 0   ;;  %vm343_vm3 = vcmask 523264  }
   0x9   :  { %3467 = vmatpush3.bf16.msra.mxu0 %v3464_v6  ;;  %v27_v19 = vld [vmem:[%s4641_s1 + $0x10] sm:$0xff]  ;;  %3701 = vmatprep.subr.bf16.mxu1 %v3472_v15  ;;  %v3474_v20 = vpack.c.bf16 %v169_v18, %v167_v17  ;;  %v30_v23 = vld [vmem:[%s4641_s1 + $0x28] sm:$0xff]  ;;  %v32_v25 = vld [vmem:[%s4641_s1 + $0x38] sm:$0xff]  ;;  %v3917_v2 = vshrl.u32 %v323_v0, 7  ;;  %vm542_vm5 = vcmask 130048   ;;  %vm970_vm7 = vcmask 64512  }
   0xa   :  { %3469 = vmatprep.subr.bf16.mxu0 %v3468_v10  ;;  %v31_v24 = vld [vmem:[%s4641_s1 + $0x30] sm:$0xff]  ;;  %v335_v45 = vld [vmem:[%s4643_s3] sm:$0xff]  ;;  %v336_v46 = vld [vmem:[%s4643_s3 + $0x8] sm:$0xff]  ;;  %vm1180_vm8 = vcmask 519168   ;;  %vm1381_vm10 = vcmask 1043456   ;;  %vm1371_vm11 = vcmask 31744  }
   0xb   :  { %v3878_v49 = vpack.c.bf16 %v336_v46, %v335_v45  ;;  %v337_v52 = vld [vmem:[%s4643_s3 + $0x10] sm:$0xff]  ;;  %v338_v53 = vld [vmem:[%s4643_s3 + $0x18] sm:$0xff]  ;;  %v339_v57 = vld [vmem:[%s4643_s3 + $0x20] sm:$0xff]  ;;  %v3920_v6 = vsub.s32 0, %v3917_v2  ;;  %s3752_s11 = smov 96   ;;  %s3753_s13 = smov [#allocation2]  }
   0xc   :  { %3155 = vmatmul.mubr.msk.f32.vlgmr.msra.gmra.mrb[0].mxu0 %vm33_vm0, %v26_v16  ;;  %3703 = vmatpush1.bf16.msra.mxu1 %v3474_v20  ;;  %v3889_v55 = vpack.c.bf16 %v338_v53, %v337_v52  ;;  %v340_v58 = vld [vmem:[%s4643_s3 + $0x28] sm:$0xff]  ;;  %v341_v61 = vld [vmem:[%s4643_s3 + $0x30] sm:$0xff]  ;;  %v342_v62 = vld [vmem:[%s4643_s3 + $0x38] sm:$0xff] }
   0xd   :  { %3157 = vmatprep.mubr.msk.f32.mxu0 %vm33_vm0, %v27_v19  ;;  %3471 = vmatpush1.bf16.msra.mxu0 %v3470_v14  ;;  %v3900_v60 = vpack.c.bf16 %v340_v58, %v339_v57  ;;  %v3911_v63 = vpack.c.bf16 %v342_v62, %v341_v61  ;;  %v3925_v8 = vld [vmem:[%s4644_s4] sm:$0x7]  ;;  %v649_v57 = vld [vmem:[%s4642_s2 + $0x88] sm:$0xff]  ;;  %v651_v58 = vld [vmem:[%s4642_s2 + $0x98] sm:$0xff] }
   0xe   :  { %3473 = vmatprep.subr.bf16.mxu0 %v3472_v15  ;;  %v326_v10 = vrot.slane %v3925_v8, %v3920_v6  ;;  %v640_v45 = vld [vmem:[%s4642_s2 + $0x40] sm:$0xff]  ;;  %v3512_v61 = vpack.c.bf16 %v651_v58, %v649_v57  ;;  %v650_v0 = vld [vmem:[%s4642_s2 + $0x90] sm:$0xff] }
   0xf   :  { %v648_v62 = vld [vmem:[%s4642_s2 + $0x80] sm:$0xff] }
  0x10   :  { %3158 = vmatmul.mubr.msk.f32.gmra.mrb[2].mxu0 %vm33_vm0, %v28_v21 }
  0x11   :  { %3160 = vmatprep.mubr.msk.f32.mxu0 %vm33_vm0, %v29_v22  ;;  %3475 = vmatpush1.bf16.msra.mxu0 %v3474_v20 }
  0x12   :  { %3476 = vmatprep.subr.bf16.mxu0 %v3749_v50 }
  0x14   :  { %3161 = vmatmul.mubr.msk.f32.gmra.mrb[4].mxu0 %vm33_vm0, %v30_v23 }
  0x15   :  { %3163 = vmatprep.mubr.msk.f32.mxu0 %vm33_vm0, %v31_v24 }
  0x18   :  { %3164 = vmatmul.mubr.msk.f32.gmra.mrb[6].mxu0 %vm33_vm0, %v32_v25 }
  0x19   :  { %259 = vmatprep.mubr.f32.mxu0 %v3747_v26 }
  0xdf   :  { %v3156_v27 = vpop.f32.mrb[0].mxu0 }
  0xe0   :  { %v124_v28 = vpop.f32.mrb[1].mxu0 }
  0xe1   :  { %2893 = vmatmul.mubr.msk.f32.vlgmr.msra.gmra.mrb[8].mxu0 %vm33_vm0, %v124_v28 }
  0xe2   :  { %264 = vmatprep.mubr.f32.mxu0 %v3747_v26  ;;  %3478 = vmatpush3.bf16.msra.mxu0 %v3878_v49 }
  0xe3   :  { %v3159_v29 = vpop.f32.mrb[2].mxu0  ;;  %3479 = vmatprep.subr.bf16.mxu0 %v3749_v50 }
  0xe4   :  { %v134_v30 = vpop.f32.mrb[3].mxu0 }
  0xe5   :  { %2894 = vmatmul.mubr.msk.f32.gmra.mrb[10].mxu0 %vm33_vm0, %v3156_v27 }
  0xe6   :  { %269 = vmatprep.mubr.f32.mxu0 %v3747_v26  ;;  %3481 = vmatpush3.bf16.msra.mxu0 %v3889_v55 }
  0xe7   :  { %v3162_v31 = vpop.f32.mrb[4].mxu0  ;;  %3482 = vmatprep.subr.bf16.mxu0 %v3749_v50 }
  0xe8   :  { %v144_v32 = vpop.f32.mrb[5].mxu0 }
  0xe9   :  { %2895 = vmatmul.mubr.msk.f32.gmra.mrb[12].mxu0 %vm33_vm0, %v134_v30  ;;  %2897 = vmatmul.mubr.msk.f32.vlgmr.msra.gmra.mrb[0].mxu1 %vm33_vm0, %v144_v32 }
  0xea   :  { %274 = vmatprep.mubr.f32.mxu0 %v3747_v26  ;;  %284 = vmatprep.mubr.f32.mxu1 %v3747_v26 }
  0xeb   :  { %v3165_v33 = vpop.f32.mrb[6].mxu0  ;;  %3484 = vmatpush3.bf16.msra.mxu0 %v3900_v60 }
  0xec   :  { %v154_v34 = vpop.f32.mrb[7].mxu0  ;;  %3485 = vmatprep.subr.bf16.mxu0 %v3749_v50 }
  0xed   :  { %2896 = vmatmul.mubr.msk.f32.gmra.mrb[14].mxu0 %vm33_vm0, %v3159_v29  ;;  %2898 = vmatmul.mubr.msk.f32.gmra.mrb[2].mxu1 %vm33_vm0, %v3162_v31 }
  0xee   :  { %289 = vmatprep.mubr.f32.mxu1 %v3747_v26  ;;  %3182 = vmatprep.mubr.msk.f32.mxu0 %vm3750_vm1, %v3747_v26 }
  0xef   :  { %3487 = vmatpush3.bf16.msra.mxu0 %v3911_v63 }
  0xf0   :  { %3488 = vmatprep.subr.bf16.mxu0 %v3749_v50 }
  0xf1   :  { %2899 = vmatmul.mubr.msk.f32.gmra.mrb[4].mxu1 %vm33_vm0, %v154_v34 }
  0xf2   :  { %294 = vmatprep.mubr.f32.mxu1 %v3747_v26 }
  0xf5   :  { %2900 = vmatmul.mubr.msk.f32.gmra.mrb[6].mxu1 %vm33_vm0, %v3165_v33 }
 0x1b4   :  { %v261_v35 = vpop.f32.mrb[8].mxu0 }
 0x1b5   :  { %v263_v36 = vpop.f32.mrb[9].mxu0 }
 0x1b8   :  { %v266_v37 = vpop.f32.mrb[10].mxu0 }
 0x1b9   :  { %v268_v38 = vpop.f32.mrb[11].mxu0 }
 0x1bc   :  { %v271_v39 = vpop.f32.mrb[12].mxu0  ;;  %v281_v40 = vpop.f32.mrb[0].mxu1 }
 0x1bd   :  { %v282_v41 = vpop.f32.mrb[1].mxu1  ;;  %302 = vrot.lane.b32.xlu0 %v271_v39, %s3748_s7  ;;  %v273_v42 = vpop.f32.mrb[13].mxu0 }
 0x1be   :  { %v538_v42 = vld [vmem:[%s4641_s1 + $0x40] sm:$0xff] }
 0x1bf   :  { %3208 = vmatprep.mubr.msk.f32.mxu1 %vm542_vm5, %v538_v42  ;;  %v774_v42 = vld [vmem:[%s4643_s3 + $0x40] sm:$0xff] }
 0x1c0   :  { %v276_v43 = vpop.f32.mrb[14].mxu0  ;;  %v286_v44 = vpop.f32.mrb[2].mxu1 }
 0x1c1   :  { %v287_v47 = vpop.f32.mrb[3].mxu1  ;;  %304 = vrot.lane.b32.xlu0 %v276_v43, %s3748_s7  ;;  %v278_v48 = vpop.f32.mrb[15].mxu0  ;;  %v641_v43 = vld [vmem:[%s4642_s2 + $0x48] sm:$0xff]  ;;  %v643_v44 = vld [vmem:[%s4642_s2 + $0x58] sm:$0xff] }
 0x1c2   :  { %v3504_v46 = vpack.c.bf16 %v643_v44, %v641_v43  ;;  %v645_v48 = vld [vmem:[%s4642_s2 + $0x68] sm:$0xff] }
 0x1c3   :  { %v775_v43 = vld [vmem:[%s4643_s3 + $0x48] sm:$0xff] }
 0x1c4   :  { %v291_v51 = vpop.f32.mrb[4].mxu1 }
 0x1c5   :  { %v292_v54 = vpop.f32.mrb[5].mxu1  ;;  %v647_v51 = vld [vmem:[%s4642_s2 + $0x78] sm:$0xff] }
 0x1c6   :  { %314 = vrot.lane.b32.xlu1 %v292_v54, %s3748_s7  ;;  %v3508_v53 = vpack.c.bf16 %v647_v51, %v645_v48  ;;  %v644_v54 = vld [vmem:[%s4642_s2 + $0x60] sm:$0xff]  ;;  %v777_v48 = vld [vmem:[%s4643_s3 + $0x58] sm:$0xff] }
 0x1c8   :  { %v296_v56 = vpop.f32.mrb[6].mxu1 }
 0x1c9   :  { %v297_v59 = vpop.f32.mrb[7].mxu1  ;;  %v646_v56 = vld [vmem:[%s4642_s2 + $0x70] sm:$0xff] }
 0x1ca   :  { %316 = vrot.lane.b32.xlu1 %v297_v59, %s3748_s7  ;;  %v3510_v59 = vpack.c.bf16 %v646_v56, %v644_v54  ;;  %v778_v54 = vld [vmem:[%s4643_s3 + $0x60] sm:$0xff]  ;;  %v779_v56 = vld [vmem:[%s4643_s3 + $0x68] sm:$0xff] }
 0x1cb   :  { %v4073_v58 = vpack.c.bf16 %v779_v56, %v778_v54  ;;  %v1054_v54 = vld [vmem:[%s4642_s2 + $0xd0] sm:$0xff]  ;;  %v1057_v56 = vld [vmem:[%s4642_s2 + $0xe8] sm:$0xff] }
 0x22f   :  { %v303_v1 = vpop.permute.xlu0 %302 }
 0x230   :  { %v308_v3 = vadd.f32 %v303_v1, %v261_v35  ;;  %v653_v1 = vld [vmem:[%s4642_s2 + $0xa8] sm:$0xff] }
 0x232   :  { %v310_v4 = vadd.f32 %v308_v3, %v282_v41  ;;  %v655_v3 = vld [vmem:[%s4642_s2 + $0xb8] sm:$0xff] }
 0x233   :  { %v305_v5 = vpop.permute.xlu0 %304 }
 0x234   :  { %v309_v7 = vadd.f32 %v305_v5, %v266_v37  ;;  %v3516_v5 = vpack.c.bf16 %v655_v3, %v653_v1 }
 0x236   :  { %v311_v9 = vadd.f32 %v309_v7, %v287_v47  ;;  %v642_v47 = vld [vmem:[%s4642_s2 + $0x50] sm:$0xff]  ;;  %v652_v7 = vld [vmem:[%s4642_s2 + $0xa0] sm:$0xff] }
 0x237   :  { %v3506_v52 = vpack.c.bf16 %v642_v47, %v640_v45  ;;  %v4048_v45 = vpack.c.bf16 %v775_v43, %v774_v42  ;;  %v776_v47 = vld [vmem:[%s4643_s3 + $0x50] sm:$0xff] }
 0x238   :  { %v315_v11 = vpop.permute.xlu1 %314 }
 0x239   :  { %v320_v12 = vadd.f32 %v315_v11, %v310_v4  ;;  %v3514_v4 = vpack.c.bf16 %v650_v0, %v648_v62  ;;  %v781_v62 = vld [vmem:[%s4643_s3 + $0x78] sm:$0xff] }
 0x23b   :  { %v327_v13 = vadd.f32 %v326_v10, %v320_v12 }
 0x23c   :  { %v317_v14 = vpop.permute.xlu1 %316 }
 0x23d   :  { %v331_v15 = vmul.f32 0.2, %v327_v13  ;;  %v321_v16 = vadd.f32 %v317_v14, %v311_v9  ;;  %vm329_vm2 = vcmp.ge.f32.partialorder %v327_v13, 0.0  ;;  %v654_v9 = vld [vmem:[%s4642_s2 + $0xb0] sm:$0xff] }
 0x23f   :  { %v328_v17 = vadd.f32 %v326_v10, %v321_v16  ;;  %v3929_v18 = vsel %vm329_vm2, %v327_v13, %v331_v15  ;;  %v3518_v10 = vpack.c.bf16 %v654_v9, %v652_v7 }
 0x240   :  { %v344_v21 = vsel %vm343_vm3, %v3929_v18, 0.0  ;;  %v353_v22 = vmul.f32 %v3929_v18, %v3929_v18 }
 0x241   :  { %vm330_vm4 = vcmp.ge.f32.partialorder %v328_v17, 0.0  ;;  %v332_v19 = vmul.f32 0.2, %v328_v17 }
 0x242   :  { %v355_v29 = vsel %vm343_vm3, %v353_v22, 0.0  ;;  %v523_v22 = vrot.slane %v3925_v8, 1 }
 0x243   :  { %v3931_v20 = vsel %vm330_vm4, %v328_v17, %v332_v19 }
 0x244   :  { %v345_v23 = vsel %vm343_vm3, %v3931_v20, 0.0  ;;  %v354_v24 = vmul.f32 %v3931_v20, %v3931_v20 }
 0x245   :  { %v346_v25 = vadd.f32 %v345_v23, %v344_v21 }
 0x246   :  { %v356_v27 = vsel %vm343_vm3, %v354_v24, 0.0  ;;  %v4011_v24 = vsub.s32 2, %v3917_v2  ;;  %v539_v2 = vld [vmem:[%s4641_s1 + $0x48] sm:$0xff] }
 0x247   :  { %v347_v28 = vrot.slane %v346_v25, 4  ;;  %v357_v31 = vadd.f32 %v356_v27, %v355_v29 }
 0x249   :  { %v348_v30 = vadd.f32 %v347_v28, %v346_v25  ;;  %v358_v34 = vrot.slane %v357_v31, 4 }
 0x24b   :  { %v349_v32 = vrot.slane %v348_v30, 2  ;;  %v359_v37 = vadd.f32 %v358_v34, %v357_v31  ;;  %v535_v31 = vrot.slane %v3925_v8, %v4011_v24  ;;  %v541_v8 = vld [vmem:[%s4641_s1 + $0x58] sm:$0xff] }
 0x24d   :  { %v350_v33 = vadd.f32 %v349_v32, %v348_v30  ;;  %v360_v38 = vrot.slane %v359_v37, 2 }
 0x24f   :  { %v351_v35 = vrot.slane %v350_v33, 1  ;;  %v361_v39 = vadd.f32 %v360_v38, %v359_v37 }
 0x251   :  { %v352_v36 = vadd.f32 %v351_v35, %v350_v33  ;;  %v362_v40 = vrot.slane %v361_v39, 1 }
 0x253   :  { %3183 = vmatmul.mubr.msk.f32.vlgmr.msra.gmra.mrb[16].mxu0 %vm343_vm3, %v352_v36  ;;  %v363_v41 = vadd.f32 %v362_v40, %v361_v39 }
 0x254   :  { %3490 = vmatpush3.bf16.msra.mxu0 %v3878_v49  ;;  %3201 = vmatprep.mubr.msk.f32.mxu0 %vm3750_vm1, %v3747_v26 }
 0x255   :  { %3491 = vmatprep.subr.bf16.mxu0 %v3749_v50 }
 0x258   :  { %3493 = vmatpush3.bf16.msra.mxu0 %v3889_v55 }
 0x259   :  { %3494 = vmatprep.subr.bf16.mxu0 %v3749_v50 }
 0x25c   :  { %3496 = vmatpush3.bf16.msra.mxu0 %v3900_v60 }
 0x25d   :  { %3497 = vmatprep.subr.bf16.mxu0 %v3749_v50 }
 0x260   :  { %3499 = vmatpush3.bf16.msra.mxu0 %v3911_v63 }
 0x261   :  { %3505 = vmatprep.subr.bf16.mxu0 %v3504_v46 }
 0x263   :  { %3202 = vmatmul.mubr.msk.f32.vlgmr.msra.gmra.mrb[18].mxu0 %vm343_vm3, %v363_v41 }
 0x264   :  { %732 = vmatprep.mubr.f32.mxu0 %v3747_v26  ;;  %3507 = vmatpush1.bf16.msra.mxu0 %v3506_v52  ;;  %v4061_v52 = vpack.c.bf16 %v777_v48, %v776_v47  ;;  %v1053_v47 = vld [vmem:[%s4642_s2 + $0xc8] sm:$0xff]  ;;  %v1055_v48 = vld [vmem:[%s4642_s2 + $0xd8] sm:$0xff] }
 0x265   :  { %3509 = vmatprep.subr.bf16.mxu0 %v3508_v53 }
 0x268   :  { %3511 = vmatpush1.bf16.msra.mxu0 %v3510_v59 }
 0x269   :  { %3513 = vmatprep.subr.bf16.mxu0 %v3512_v61  ;;  %v780_v61 = vld [vmem:[%s4643_s3 + $0x70] sm:$0xff] }
 0x26a   :  { %v4085_v0 = vpack.c.bf16 %v781_v62, %v780_v61  ;;  %v3544_v61 = vpack.c.bf16 %v1055_v48, %v1053_v47  ;;  %v969_v62 = vld [vmem:[%s4641_s1 + $0x68] sm:$0xff] }
 0x26c   :  { %3515 = vmatpush1.bf16.msra.mxu0 %v3514_v4 }
 0x26d   :  { %3517 = vmatprep.subr.bf16.mxu0 %v3516_v5  ;;  %v2911_v5 = vld [vmem:[%s4644_s4 + $0x4] sm:$0x7] }
 0x26e   :  { %v769_v7 = vrot.slane %v2911_v5, %v3920_v6 }
 0x270   :  { %3519 = vmatpush1.bf16.msra.mxu0 %v3518_v10 }
 0x271   :  { %3532 = vmatprep.subr.bf16.mxu0 %v3749_v50 }
 0x326   :  { %v433_v11 = vpop.f32.mrb[16].mxu0 }
 0x327   :  { %v3184_v12 = vpop.f32.mrb[17].mxu0  ;;  %v437_v13 = vmul.f32 0.0078125, %v433_v11 }
 0x329   :  { %v512_v15 = vmul.f32 %v437_v13, %v437_v13  ;;  %v517_v23 = vrot.slane %v437_v13, %v3920_v6 }
 0x32b   :  { %v518_v28 = vsub.f32 %v3929_v18, %v517_v23  ;;  %v519_v29 = vsub.f32 %v3931_v20, %v517_v23  ;;  %v540_v18 = vld [vmem:[%s4641_s1 + $0x50] sm:$0xff] }
 0x336   :  { %v507_v14 = vpop.f32.mrb[18].mxu0 }
 0x337   :  { %v511_v16 = vmul.f32 0.0078125, %v507_v14  ;;  %v3203_v17 = vpop.f32.mrb[19].mxu0 }
 0x339   :  { %v513_v19 = vsub.f32 %v511_v16, %v512_v15 }
 0x33b   :  { %v520_v21 = vadd.f32 1e-05, %v513_v19 }
 0x33d   :  { %3713 = vrsqrt.f32 %v520_v21 }
 0x347   :  { %v3714_v25 = vpop.eup %3713 }
 0x348   :  { %v525_v27 = vmul.f32 %v3714_v25, %v523_v22 }
 0x34a   :  { %v529_v30 = vrot.slane %v525_v27, %v3920_v6 }
 0x34c   :  { %v530_v32 = vmul.f32 %v529_v30, %v518_v28  ;;  %v531_v33 = vmul.f32 %v529_v30, %v519_v29 }
 0x34e   :  { %v536_v34 = vadd.f32 %v535_v31, %v530_v32  ;;  %v537_v35 = vadd.f32 %v535_v31, %v531_v33  ;;  %v968_v33 = vld [vmem:[%s4641_s1 + $0x60] sm:$0xff] }
 0x350   :  { %v3500_v36 = vpack.c.bf16 %v537_v35, %v536_v34 }
 0x352   :  { %3501 = vmatprep.subr.bf16.mxu1 %v3500_v36 }
 0x353   :  { %3503 = vmatpush3.bf16.msra.mxu1 %v3500_v36 }
 0x354   :  { %3520 = vmatprep.subr.bf16.mxu1 %v3749_v50 }
 0x356   :  { %3209 = vmatmul.mubr.msk.f32.vlgmr.msra.gmra.mrb[8].mxu1 %vm542_vm5, %v539_v2 }
 0x357   :  { %3211 = vmatprep.mubr.msk.f32.mxu1 %vm542_vm5, %v540_v18  ;;  %3522 = vmatpush3.bf16.msra.mxu1 %v4048_v45 }
 0x358   :  { %3523 = vmatprep.subr.bf16.mxu1 %v3749_v50 }
 0x35a   :  { %3212 = vmatmul.mubr.msk.f32.gmra.mrb[10].mxu1 %vm542_vm5, %v541_v8 }
 0x35b   :  { %3230 = vmatprep.mubr.msk.f32.mxu1 %vm3750_vm1, %v3747_v26  ;;  %3525 = vmatpush3.bf16.msra.mxu1 %v4061_v52 }
 0x35c   :  { %3526 = vmatprep.subr.bf16.mxu1 %v3749_v50 }
 0x35f   :  { %3528 = vmatpush3.bf16.msra.mxu1 %v4073_v58 }
 0x360   :  { %3529 = vmatprep.subr.bf16.mxu1 %v3749_v50 }
 0x363   :  { %3531 = vmatpush3.bf16.msra.mxu1 %v4085_v0 }
 0x429   :  { %v3210_v20 = vpop.f32.mrb[8].mxu1 }
 0x42a   :  { %v621_v37 = vpop.f32.mrb[9].mxu1 }
 0x42b   :  { %2907 = vmatmul.mubr.msk.f32.vlgmr.msra.gmra.mrb[20].mxu0 %vm343_vm3, %v621_v37 }
 0x42c   :  { %737 = vmatprep.mubr.f32.mxu0 %v3747_v26  ;;  %3534 = vmatpush3.bf16.msra.mxu0 %v4048_v45 }
 0x42d   :  { %v3213_v38 = vpop.f32.mrb[10].mxu1  ;;  %3535 = vmatprep.subr.bf16.mxu0 %v3749_v50 }
 0x42e   :  { %v631_v39 = vpop.f32.mrb[11].mxu1 }
 0x42f   :  { %2908 = vmatmul.mubr.msk.f32.gmra.mrb[22].mxu0 %vm343_vm3, %v3210_v20 }
 0x430   :  { %742 = vmatprep.mubr.f32.mxu0 %v3747_v26  ;;  %3537 = vmatpush3.bf16.msra.mxu0 %v4061_v52 }
 0x431   :  { %3538 = vmatprep.subr.bf16.mxu0 %v3749_v50 }
 0x433   :  { %2909 = vmatmul.mubr.msk.f32.gmra.mrb[24].mxu0 %vm343_vm3, %v631_v39  ;;  %v955_v39 = vrot.slane %v2911_v5, 1 }
 0x434   :  { %747 = vmatprep.mubr.f32.mxu0 %v3747_v26  ;;  %3540 = vmatpush3.bf16.msra.mxu0 %v4073_v58 }
 0x435   :  { %3541 = vmatprep.subr.bf16.mxu0 %v3749_v50 }
 0x437   :  { %2910 = vmatmul.mubr.msk.f32.gmra.mrb[26].mxu0 %vm343_vm3, %v3213_v38 }
 0x438   :  { %3249 = vmatprep.mubr.msk.f32.mxu0 %vm3750_vm1, %v3747_v26  ;;  %3543 = vmatpush3.bf16.msra.mxu0 %v4085_v0 }
 0x439   :  { %3560 = vmatprep.subr.bf16.mxu0 %v3749_v50 }
 0x4fe   :  { %v734_v40 = vpop.f32.mrb[20].mxu0 }
 0x4ff   :  { %v736_v41 = vpop.f32.mrb[21].mxu0 }
 0x502   :  { %v739_v44 = vpop.f32.mrb[22].mxu0 }
 0x503   :  { %754 = vrot.lane.b32.xlu0 %v739_v44, %s3748_s7  ;;  %v741_v46 = vpop.f32.mrb[23].mxu0 }
 0x504   :  { %v966_v46 = vrot.slane %v2911_v5, %v4011_v24  ;;  %v1058_v5 = vld [vmem:[%s4642_s2 + $0xf0] sm:$0xff] }
 0x506   :  { %v744_v51 = vpop.f32.mrb[24].mxu0 }
 0x507   :  { %v745_v53 = vpop.f32.mrb[25].mxu0 }
 0x50a   :  { %v749_v57 = vpop.f32.mrb[26].mxu0 }
 0x50b   :  { %v750_v59 = vpop.f32.mrb[27].mxu0  ;;  %v1059_v57 = vld [vmem:[%s4642_s2 + $0xf8] sm:$0xff] }
 0x50c   :  { %760 = vrot.lane.b32.xlu1 %v750_v59, %s3748_s7 }
 0x575   :  { %v755_v1 = vpop.permute.xlu0 %754 }
 0x576   :  { %v757_v3 = vadd.f32 %v755_v1, %v734_v40 }
 0x578   :  { %v758_v4 = vadd.f32 %v757_v3, %v745_v53  ;;  %v1052_v53 = vld [vmem:[%s4642_s2 + $0xc0] sm:$0xff]  ;;  %v3548_v3 = vpack.c.bf16 %v1059_v57, %v1057_v56 }
 0x579   :  { %v3546_v1 = vpack.c.bf16 %v1054_v54, %v1052_v53 }
 0x57e   :  { %v761_v9 = vpop.permute.xlu1 %760 }
 0x57f   :  { %v763_v10 = vadd.f32 %v761_v9, %v758_v4  ;;  %v1056_v4 = vld [vmem:[%s4642_s2 + $0xe0] sm:$0xff]  ;;  %v1063_v9 = vld [vmem:[%s4642_s2 + $0x118] sm:$0xff] }
 0x581   :  { %v770_v11 = vadd.f32 %v769_v7, %v763_v10  ;;  %v1061_v7 = vld [vmem:[%s4642_s2 + $0x108] sm:$0xff]  ;;  %v3550_v10 = vpack.c.bf16 %v1058_v5, %v1056_v4 }
 0x583   :  { %vm771_vm6 = vcmp.ge.f32.partialorder %v770_v11, 0.0  ;;  %v772_v12 = vmul.f32 0.2, %v770_v11 }
 0x585   :  { %v773_v13 = vsel %vm771_vm6, %v770_v11, %v772_v12  ;;  %v3552_v11 = vpack.c.bf16 %v1063_v9, %v1061_v7  ;;  %v1060_v12 = vld [vmem:[%s4642_s2 + $0x100] sm:$0xff] }
 0x586   :  { %v782_v14 = vsel %vm343_vm3, %v773_v13, 0.0  ;;  %v789_v15 = vmul.f32 %v773_v13, %v773_v13 }
 0x587   :  { %v783_v16 = vrot.slane %v782_v14, 4 }
 0x588   :  { %v790_v17 = vsel %vm343_vm3, %v789_v15, 0.0  ;;  %v1067_v15 = vld [vmem:[%s4642_s2 + $0x138] sm:$0xff] }
 0x589   :  { %v784_v19 = vadd.f32 %v783_v16, %v782_v14  ;;  %v791_v21 = vrot.slane %v790_v17, 4  ;;  %v1065_v14 = vld [vmem:[%s4642_s2 + $0x128] sm:$0xff] }
 0x58b   :  { %v785_v22 = vrot.slane %v784_v19, 2  ;;  %v792_v23 = vadd.f32 %v791_v21, %v790_v17  ;;  %v3556_v17 = vpack.c.bf16 %v1067_v15, %v1065_v14  ;;  %v1066_v21 = vld [vmem:[%s4642_s2 + $0x130] sm:$0xff] }
 0x58d   :  { %v786_v25 = vadd.f32 %v785_v22, %v784_v19  ;;  %v793_v27 = vrot.slane %v792_v23, 2  ;;  %v1064_v19 = vld [vmem:[%s4642_s2 + $0x120] sm:$0xff] }
 0x58e   :  { %v3558_v22 = vpack.c.bf16 %v1066_v21, %v1064_v19 }
 0x58f   :  { %v787_v28 = vrot.slane %v786_v25, 1  ;;  %v794_v29 = vadd.f32 %v793_v27, %v792_v23  ;;  %v1172_v27 = vld [vmem:[%s4643_s3 + $0x80] sm:$0xff] }
 0x591   :  { %v788_v30 = vadd.f32 %v787_v28, %v786_v25  ;;  %v795_v31 = vrot.slane %v794_v29, 1  ;;  %v1173_v28 = vld [vmem:[%s4643_s3 + $0x88] sm:$0xff] }
 0x593   :  { %v796_v32 = vadd.f32 %v795_v31, %v794_v29  ;;  %3231 = vmatmul.mubr.msk.f32.vlgmr.msra.gmra.mrb[12].mxu1 %vm343_vm3, %v788_v30  ;;  %v3561_v29 = vpack.c.bf16 %v1173_v28, %v1172_v27 }
 0x594   :  { %3254 = vmatprep.mubr.msk.f32.mxu1 %vm970_vm7, %v968_v33  ;;  %v1174_v33 = vld [vmem:[%s4643_s3 + $0x90] sm:$0xff] }
 0x595   :  { %3250 = vmatmul.mubr.msk.f32.vlgmr.msra.gmra.mrb[28].mxu0 %vm343_vm3, %v796_v32 }
 0x596   :  { %3273 = vmatprep.mubr.msk.f32.mxu0 %vm3750_vm1, %v3747_v26  ;;  %3562 = vmatpush3.bf16.msra.mxu0 %v3561_v29 }
 0x597   :  { %3563 = vmatprep.subr.bf16.mxu0 %v3749_v50 }
 0x666   :  { %v866_v34 = vpop.f32.mrb[12].mxu1 }
 0x667   :  { %v870_v35 = vmul.f32 0.03125, %v866_v34  ;;  %v3232_v36 = vpop.f32.mrb[13].mxu1  ;;  %v1175_v34 = vld [vmem:[%s4643_s3 + $0x98] sm:$0xff] }
 0x668   :  { %v940_v2 = vpop.f32.mrb[28].mxu0 }
 0x669   :  { %v945_v18 = vmul.f32 %v870_v35, %v870_v35  ;;  %v944_v8 = vmul.f32 0.03125, %v940_v2  ;;  %v3251_v20 = vpop.f32.mrb[29].mxu0  ;;  %v950_v40 = vrot.slane %v870_v35, %v3920_v6  ;;  %v3564_v35 = vpack.c.bf16 %v1175_v34, %v1174_v33 }
 0x66b   :  { %v946_v37 = vsub.f32 %v944_v8, %v945_v18  ;;  %v951_v43 = vsub.f32 %v773_v13, %v950_v40  ;;  %v1062_v13 = vld [vmem:[%s4642_s2 + $0x110] sm:$0xff]  ;;  %3565 = vmatpush3.bf16.msra.mxu0 %v3564_v35  ;;  %v1176_v18 = vld [vmem:[%s4643_s3 + $0xa0] sm:$0xff]  ;;  %v1177_v8 = vld [vmem:[%s4643_s3 + $0xa8] sm:$0xff] }
 0x66c   :  { %v3554_v16 = vpack.c.bf16 %v1062_v13, %v1060_v12  ;;  %3566 = vmatprep.subr.bf16.mxu0 %v3749_v50 }
 0x66d   :  { %v952_v38 = vadd.f32 1e-05, %v946_v37  ;;  %v3567_v37 = vpack.c.bf16 %v1177_v8, %v1176_v18  ;;  %v1465_v18 = vld [vmem:[%s4642_s2 + $0x140] sm:$0xff]  ;;  %v1467_v8 = vld [vmem:[%s4642_s2 + $0x150] sm:$0xff] }
 0x66f   :  { %3715 = vrsqrt.f32 %v952_v38  ;;  %3568 = vmatpush3.bf16.msra.mxu0 %v3567_v37  ;;  %v1178_v38 = vld [vmem:[%s4643_s3 + $0xb0] sm:$0xff] }
 0x670   :  { %3569 = vmatprep.subr.bf16.mxu0 %v3749_v50 }
 0x679   :  { %v3716_v41 = vpop.eup %3715 }
 0x67a   :  { %v957_v42 = vmul.f32 %v3716_v41, %v955_v39  ;;  %v1179_v39 = vld [vmem:[%s4643_s3 + $0xb8] sm:$0xff] }
 0x67b   :  { %v3570_v40 = vpack.c.bf16 %v1179_v39, %v1178_v38  ;;  %v1472_v38 = vld [vmem:[%s4642_s2 + $0x178] sm:$0xff] }
 0x67c   :  { %v961_v44 = vrot.slane %v957_v42, %v3920_v6 }
 0x67d   :  { %3571 = vmatpush3.bf16.msra.mxu0 %v3570_v40 }
 0x67e   :  { %v962_v51 = vmul.f32 %v961_v44, %v951_v43  ;;  %3295 = vmatprep.subr.mxu0 %v3747_v26  ;;  %v2918_v43 = vld [vmem:[%s4644_s4 + $0x8] sm:$0x7] }
 0x67f   :  { %v1354_v28 = vrot.slane %v2918_v43, 1 }
 0x680   :  { %v4126_v59 = vadd.f32 %v966_v46, %v962_v51  ;;  %v1167_v46 = vrot.slane %v2918_v43, %v3920_v6 }
 0x682   :  { %3252 = vmatprep.subr.mxu1 %v4126_v59 }
 0x683   :  { %3253 = vmatpush3.msra.mxu1 %v4126_v59 }
 0x684   :  { %3255 = vmatmul.mubr.msk.f32.vlgmr.msra.gmra.mrb[14].mxu1 %vm970_vm7, %v969_v62  ;;  %3545 = vmatprep.subr.bf16.mxu1 %v3544_v61 }
 0x685   :  { %3547 = vmatpush1.bf16.msra.mxu1 %v3546_v1  ;;  %1138 = vmatprep.mubr.f32.mxu1 %v3747_v26 }
 0x686   :  { %3549 = vmatprep.subr.bf16.mxu1 %v3548_v3 }
 0x689   :  { %3551 = vmatpush1.bf16.msra.mxu1 %v3550_v10 }
 0x68a   :  { %3553 = vmatprep.subr.bf16.mxu1 %v3552_v11 }
 0x68d   :  { %3555 = vmatpush1.bf16.msra.mxu1 %v3554_v16 }
 0x68e   :  { %3557 = vmatprep.subr.bf16.mxu1 %v3556_v17 }
 0x691   :  { %3559 = vmatpush1.bf16.msra.mxu1 %v3558_v22 }
 0x692   :  { %3572 = vmatprep.subr.bf16.mxu1 %v3749_v50 }
 0x757   :  { %v3256_v23 = vpop.f32.mrb[14].mxu1 }
 0x758   :  { %v1043_v25 = vpop.f32.mrb[15].mxu1 }
 0x759   :  { %2916 = vmatmul.mubr.msk.f32.vlgmr.msra.gmra.mrb[16].mxu1 %vm343_vm3, %v1043_v25 }
 0x75a   :  { %1143 = vmatprep.mubr.f32.mxu1 %v3747_v26  ;;  %3574 = vmatpush3.bf16.msra.mxu1 %v3561_v29 }
 0x75b   :  { %3575 = vmatprep.subr.bf16.mxu1 %v3749_v50 }
 0x75d   :  { %2917 = vmatmul.mubr.msk.f32.gmra.mrb[18].mxu1 %vm343_vm3, %v3256_v23 }
 0x75e   :  { %3292 = vmatprep.mubr.msk.f32.mxu1 %vm3750_vm1, %v3747_v26  ;;  %3577 = vmatpush3.bf16.msra.mxu1 %v3564_v35 }
 0x75f   :  { %3578 = vmatprep.subr.bf16.mxu1 %v3749_v50 }
 0x762   :  { %3580 = vmatpush3.bf16.msra.mxu1 %v3567_v37  ;;  %v1470_v37 = vld [vmem:[%s4642_s2 + $0x168] sm:$0xff] }
 0x763   :  { %3581 = vmatprep.subr.bf16.mxu1 %v3749_v50 }
 0x766   :  { %3583 = vmatpush3.bf16.msra.mxu1 %v3570_v40 }
 0x767   :  { %3600 = vmatprep.subr.bf16.mxu1 %v3749_v50 }
 0x82c   :  { %v1140_v30 = vpop.f32.mrb[16].mxu1 }
 0x82d   :  { %v1150_v31 = vrot.slane %v1140_v30, 4  ;;  %v1142_v32 = vpop.f32.mrb[17].mxu1 }
 0x82e   :  { %v1365_v32 = vrot.slane %v2918_v43, %v4011_v24  ;;  %v3588_v43 = vpack.c.bf16 %v1472_v38, %v1470_v37 }
 0x82f   :  { %1151 = vrot.lane.b32.xlu0 %v1150_v31, %s3748_s7 }
 0x830   :  { %v1145_v36 = vpop.f32.mrb[18].mxu1 }
 0x831   :  { %v1146_v2 = vpop.f32.mrb[19].mxu1  ;;  %v1466_v36 = vld [vmem:[%s4642_s2 + $0x148] sm:$0xff] }
 0x832   :  { %v1157_v20 = vrot.slane %v1146_v2, 4 }
 0x834   :  { %1158 = vrot.lane.b32.xlu1 %v1157_v20, %s3748_s7 }
 0x8a1   :  { %v1152_v41 = vpop.permute.xlu0 %1151 }
 0x8a2   :  { %v1154_v42 = vadd.f32 %v1152_v41, %v1140_v30  ;;  %v1368_v41 = vld [vmem:[%s4641_s1 + $0x70] sm:$0xff] }
 0x8a4   :  { %v1155_v44 = vadd.f32 %v1154_v42, %v1146_v2  ;;  %v1468_v2 = vld [vmem:[%s4642_s2 + $0x158] sm:$0xff]  ;;  %v3586_v42 = vpack.c.bf16 %v1467_v8, %v1465_v18 }
 0x8a5   :  { %v3584_v39 = vpack.c.bf16 %v1468_v2, %v1466_v36 }
 0x8a6   :  { %v1159_v47 = vpop.permute.xlu1 %1158 }
 0x8a7   :  { %v1161_v48 = vadd.f32 %v1159_v47, %v1155_v44  ;;  %v1469_v44 = vld [vmem:[%s4642_s2 + $0x160] sm:$0xff]  ;;  %v1474_v47 = vld [vmem:[%s4642_s2 + $0x188] sm:$0xff] }
 0x8a9   :  { %v1168_v51 = vadd.f32 %v1167_v46, %v1161_v48  ;;  %v1471_v46 = vld [vmem:[%s4642_s2 + $0x170] sm:$0xff]  ;;  %v1476_v48 = vld [vmem:[%s4642_s2 + $0x198] sm:$0xff] }
 0x8ab   :  { %vm1169_vm9 = vcmp.ge.f32.partialorder %v1168_v51, 0.0  ;;  %v1170_v53 = vmul.f32 0.2, %v1168_v51 }
 0x8ad   :  { %v1171_v54 = vsel %vm1169_vm9, %v1168_v51, %v1170_v53  ;;  %v1369_v51 = vld [vmem:[%s4641_s1 + $0x78] sm:$0xff]  ;;  %v3590_v53 = vpack.c.bf16 %v1471_v46, %v1469_v44  ;;  %v4357_v44 = vld [vmem:[%s4641_s1 + $0xb0] sm:$0xff]  ;;  %v2127_v46 = vld [vmem:[%s4642_s2 + $0x248] sm:$0xff] }
 0x8ae   :  { %v1181_v56 = vsel %vm1180_vm8, %v1171_v54, 0.0  ;;  %v1188_v57 = vmul.f32 %v1171_v54, %v1171_v54 }
 0x8af   :  { %v1182_v61 = vrot.slane %v1181_v56, 4 }
 0x8b0   :  { %v1189_v62 = vsel %vm1180_vm8, %v1188_v57, 0.0  ;;  %v1475_v57 = vld [vmem:[%s4642_s2 + $0x190] sm:$0xff] }
 0x8b1   :  { %v1183_v1 = vadd.f32 %v1182_v61, %v1181_v56  ;;  %v1190_v3 = vrot.slane %v1189_v62, 4  ;;  %v1473_v56 = vld [vmem:[%s4642_s2 + $0x180] sm:$0xff]  ;;  %v1478_v61 = vld [vmem:[%s4642_s2 + $0x1a8] sm:$0xff] }
 0x8b3   :  { %v1184_v4 = vrot.slane %v1183_v1, 2  ;;  %v1191_v5 = vadd.f32 %v1190_v3, %v1189_v62  ;;  %v1480_v62 = vld [vmem:[%s4642_s2 + $0x1b8] sm:$0xff]  ;;  %v3594_v3 = vpack.c.bf16 %v1475_v57, %v1473_v56  ;;  %v2131_v56 = vld [vmem:[%s4642_s2 + $0x268] sm:$0xff] }
 0x8b4   :  { %v2133_v57 = vld [vmem:[%s4642_s2 + $0x278] sm:$0xff] }
 0x8b5   :  { %v1185_v7 = vadd.f32 %v1184_v4, %v1183_v1  ;;  %v1192_v9 = vrot.slane %v1191_v5, 2  ;;  %v1370_v1 = vld [vmem:[%s4641_s1 + $0x80] sm:$0xff]  ;;  %v3596_v4 = vpack.c.bf16 %v1480_v62, %v1478_v61  ;;  %v3644_v61 = vpack.c.bf16 %v2133_v57, %v2131_v56  ;;  %v1903_v56 = vld [vmem:[%s4642_s2 + $0x230] sm:$0xff]  ;;  %v2141_v57 = vld [vmem:[%s4642_s2 + $0x2b8] sm:$0xff] }
 0x8b6   :  { %v2130_v62 = vld [vmem:[%s4642_s2 + $0x260] sm:$0xff] }
 0x8b7   :  { %v1193_v10 = vadd.f32 %v1192_v9, %v1191_v5  ;;  %v1186_v11 = vrot.slane %v1185_v7, 1  ;;  %v1477_v5 = vld [vmem:[%s4642_s2 + $0x1a0] sm:$0xff] }
 0x8b9   :  { %v1194_v12 = vrot.slane %v1193_v10, 1  ;;  %v1187_v13 = vadd.f32 %v1186_v11, %v1185_v7  ;;  %v1479_v7 = vld [vmem:[%s4642_s2 + $0x1b0] sm:$0xff] }
 0x8ba   :  { %v3598_v9 = vpack.c.bf16 %v1479_v7, %v1477_v5  ;;  %v2137_v5 = vld [vmem:[%s4642_s2 + $0x298] sm:$0xff] }
 0x8bb   :  { %v1195_v14 = vadd.f32 %v1194_v12, %v1193_v10  ;;  %3274 = vmatmul.mubr.msk.f32.vlgmr.msra.gmra.mrb[30].mxu0 %vm343_vm3, %v1187_v13 }
 0x8bc   :  { %3297 = vmatprep.mubr.msk.f32.mxu0 %vm3750_vm1, %v3747_v26 }
 0x8bd   :  { %3293 = vmatmul.mubr.msk.f32.vlgmr.msra.gmra.mrb[20].mxu1 %vm343_vm3, %v1195_v14 }
 0x8be   :  { %3602 = vmatpush3.bf16.msra.mxu1 %v4048_v45  ;;  %3322 = vmatprep.mubr.msk.f32.mxu1 %vm3750_vm1, %v3747_v26 }
 0x8bf   :  { %3603 = vmatprep.subr.bf16.mxu1 %v3749_v50 }
 0x8c2   :  { %3605 = vmatpush3.bf16.msra.mxu1 %v4061_v52 }
 0x8c3   :  { %3606 = vmatprep.subr.bf16.mxu1 %v3749_v50 }
 0x8c6   :  { %3608 = vmatpush3.bf16.msra.mxu1 %v4073_v58 }
 0x8c7   :  { %3609 = vmatprep.subr.bf16.mxu1 %v3749_v50 }
 0x8ca   :  { %3611 = vmatpush3.bf16.msra.mxu1 %v4085_v0 }
 0x98e   :  { %v1265_v15 = vpop.f32.mrb[30].mxu0 }
 0x98f   :  { %v1269_v16 = vmul.f32 0.125, %v1265_v15  ;;  %v3275_v17 = vpop.f32.mrb[31].mxu0 }
 0x990   :  { %v1339_v19 = vpop.f32.mrb[20].mxu1 }
 0x991   :  { %v1344_v21 = vmul.f32 %v1269_v16, %v1269_v16  ;;  %v1343_v22 = vmul.f32 0.125, %v1339_v19  ;;  %v3294_v23 = vpop.f32.mrb[21].mxu1  ;;  %v1349_v29 = vrot.slane %v1269_v16, %v3920_v6 }
 0x993   :  { %v1345_v25 = vsub.f32 %v1343_v22, %v1344_v21  ;;  %v1350_v33 = vsub.f32 %v1171_v54, %v1349_v29  ;;  %v3592_v54 = vpack.c.bf16 %v1476_v48, %v1474_v47  ;;  %v2129_v47 = vld [vmem:[%s4642_s2 + $0x258] sm:$0xff] }
 0x994   :  { %v3640_v48 = vpack.c.bf16 %v2129_v47, %v2127_v46  ;;  %v1897_v47 = vld [vmem:[%s4642_s2 + $0x200] sm:$0xff] }
 0x995   :  { %v1351_v27 = vadd.f32 1e-05, %v1345_v25 }
 0x997   :  { %3717 = vrsqrt.f32 %v1351_v27 }
 0x9a1   :  { %v3718_v30 = vpop.eup %3717 }
 0x9a2   :  { %v1356_v31 = vmul.f32 %v3718_v30, %v1354_v28 }
 0x9a4   :  { %v1360_v34 = vrot.slane %v1356_v31, %v3920_v6 }
 0x9a6   :  { %v1361_v35 = vmul.f32 %v1360_v34, %v1350_v33 }
 0x9a8   :  { %v1366_v20 = vadd.f32 %v1365_v32, %v1361_v35 }
 0x9aa   :  { %v1367_v40 = vmax.f32 %v1366_v20, 0.0 }
 0x9ac   :  { %3296 = vmatpush3.msk.msra.mxu0 %vm1381_vm10, %v1367_v40  ;;  %v4330_v40 = vld [vmem:[%s4641_s1 + $0x90] sm:$0xff] }
 0x9ad   :  { %3298 = vmatmul.mubr.msk.f32.vlgmr.msra.gmra.mrb[32].mxu0 %vm1371_vm11, %v1368_v41  ;;  %3585 = vmatprep.subr.bf16.mxu0 %v3584_v39  ;;  %v1770_v39 = vld [vmem:[%s4641_s1 + $0x88] sm:$0xff]  ;;  %v4338_v41 = vld [vmem:[%s4641_s1 + $0x98] sm:$0xff] }
 0x9ae   :  { %3300 = vmatprep.mubr.msk.f32.mxu0 %vm3750_vm1, %v3747_v26  ;;  %3587 = vmatpush1.bf16.msra.mxu0 %v3586_v42  ;;  %v4343_v42 = vld [vmem:[%s4641_s1 + $0xa0] sm:$0xff] }
 0x9af   :  { %3589 = vmatprep.subr.bf16.mxu0 %v3588_v43  ;;  %v4352_v43 = vld [vmem:[%s4641_s1 + $0xa8] sm:$0xff] }
 0x9b1   :  { %3301 = vmatmul.mubr.msk.f32.gmra.mrb[34].mxu0 %vm1371_vm11, %v1369_v51  ;;  %v2126_v51 = vld [vmem:[%s4642_s2 + $0x240] sm:$0xff] }
 0x9b2   :  { %3303 = vmatprep.mubr.msk.f32.mxu0 %vm3750_vm1, %v3747_v26  ;;  %3591 = vmatpush1.bf16.msra.mxu0 %v3590_v53  ;;  %v2128_v53 = vld [vmem:[%s4642_s2 + $0x250] sm:$0xff] }
 0x9b3   :  { %3593 = vmatprep.subr.bf16.mxu0 %v3592_v54  ;;  %v3642_v54 = vpack.c.bf16 %v2128_v53, %v2126_v51 }
 0x9b5   :  { %3304 = vmatmul.mubr.msk.f32.gmra.mrb[36].mxu0 %vm1371_vm11, %v1370_v1  ;;  %v2132_v1 = vld [vmem:[%s4642_s2 + $0x270] sm:$0xff] }
 0x9b6   :  { %3595 = vmatpush1.bf16.msra.mxu0 %v3594_v3  ;;  %1554 = vmatprep.mubr.f32.mxu0 %v3747_v26  ;;  %v3646_v3 = vpack.c.bf16 %v2132_v1, %v2130_v62  ;;  %v2140_v62 = vld [vmem:[%s4642_s2 + $0x2b0] sm:$0xff] }
 0x9b7   :  { %3597 = vmatprep.subr.bf16.mxu0 %v3596_v4  ;;  %v2135_v4 = vld [vmem:[%s4642_s2 + $0x288] sm:$0xff] }
 0x9b8   :  { %v3648_v7 = vpack.c.bf16 %v2137_v5, %v2135_v4 }
 0x9ba   :  { %3599 = vmatpush1.bf16.msra.mxu0 %v3598_v9  ;;  %v2134_v9 = vld [vmem:[%s4642_s2 + $0x280] sm:$0xff] }
 0x9bb   :  { %3612 = vmatprep.subr.bf16.mxu0 %v3749_v50 }
 0xa80   :  { %v1451_v10 = vpop.f32.mrb[32].mxu0 }
 0xa81   :  { %2925 = vmatmul.mubr.msk.f32.vlgmr.msra.gmra.mrb[38].mxu0 %vm343_vm3, %v1451_v10  ;;  %v3299_v11 = vpop.f32.mrb[33].mxu0  ;;  %v2136_v10 = vld [vmem:[%s4642_s2 + $0x290] sm:$0xff] }
 0xa82   :  { %3614 = vmatpush3.bf16.msra.mxu0 %v4048_v45  ;;  %1559 = vmatprep.mubr.f32.mxu0 %v3747_v26  ;;  %v2030_v45 = vmax.f32 %v4126_v59, 0.0  ;;  %v3650_v11 = vpack.c.bf16 %v2136_v10, %v2134_v9 }
 0xa83   :  { %3615 = vmatprep.subr.bf16.mxu0 %v3749_v50 }
 0xa84   :  { %v1456_v12 = vpop.f32.mrb[34].mxu0 }
 0xa85   :  { %2926 = vmatmul.mubr.msk.f32.gmra.mrb[40].mxu0 %vm343_vm3, %v1456_v12  ;;  %v3302_v13 = vpop.f32.mrb[35].mxu0 }
 0xa86   :  { %3617 = vmatpush3.bf16.msra.mxu0 %v4061_v52  ;;  %1564 = vmatprep.mubr.f32.mxu0 %v3747_v26 }
 0xa87   :  { %3618 = vmatprep.subr.bf16.mxu0 %v3749_v50 }
 0xa88   :  { %v1461_v14 = vpop.f32.mrb[36].mxu0 }
 0xa89   :  { %2927 = vmatmul.mubr.msk.f32.gmra.mrb[42].mxu0 %vm343_vm3, %v1461_v14  ;;  %v3305_v15 = vpop.f32.mrb[37].mxu0 }
 0xa8a   :  { %3620 = vmatpush3.bf16.msra.mxu0 %v4073_v58  ;;  %3341 = vmatprep.mubr.msk.f32.mxu0 %vm3750_vm1, %v3747_v26  ;;  %v4310_v58 = vld [vmem:[%s4644_s4 + $0xc] sm:$0x7] }
 0xa8b   :  { %3621 = vmatprep.subr.bf16.mxu0 %v3749_v50  ;;  %v1581_v59 = vrot.slane %v4310_v58, %v3920_v6 }
 0xa8e   :  { %3623 = vmatpush3.bf16.msra.mxu0 %v4085_v0 }
 0xa8f   :  { %3355 = vmatprep.subr.mxu0 %v2030_v45 }
 0xb54   :  { %v1556_v52 = vpop.f32.mrb[38].mxu0 }
 0xb55   :  { %v1558_v16 = vpop.f32.mrb[39].mxu0 }
 0xb58   :  { %v1561_v17 = vpop.f32.mrb[40].mxu0 }
 0xb59   :  { %1571 = vrot.lane.b32.xlu0 %v1561_v17, %s3748_s7  ;;  %v1563_v19 = vpop.f32.mrb[41].mxu0 }
 0xb5c   :  { %v1566_v21 = vpop.f32.mrb[42].mxu0 }
 0xb5d   :  { %v1567_v22 = vpop.f32.mrb[43].mxu0  ;;  %v1756_v21 = vrot.slane %v4310_v58, 1 }
 0xbcb   :  { %v1572_v23 = vpop.permute.xlu0 %1571 }
 0xbcc   :  { %v1574_v25 = vadd.f32 %v1572_v23, %v1556_v52 }
 0xbce   :  { %v1575_v0 = vadd.f32 %v1574_v25, %v1567_v22 }
 0xbd0   :  { %v4314_v27 = vadd.f32 %v1581_v59, %v1575_v0 }
 0xbd2   :  { %v1583_v28 = vsel %vm343_vm3, %v4314_v27, 0.0  ;;  %v1590_v29 = vmul.f32 %v4314_v27, %v4314_v27 }
 0xbd3   :  { %v1584_v30 = vrot.slane %v1583_v28, 4 }
 0xbd4   :  { %v1591_v31 = vsel %vm343_vm3, %v1590_v29, 0.0 }
 0xbd5   :  { %v1585_v32 = vadd.f32 %v1584_v30, %v1583_v28  ;;  %v1592_v33 = vrot.slane %v1591_v31, 4  ;;  %v1767_v28 = vrot.slane %v4310_v58, %v4011_v24  ;;  %v1890_v30 = vld [vmem:[%s4642_s2 + $0x1c8] sm:$0xff] }
 0xbd6   :  { %v1894_v58 = vld [vmem:[%s4642_s2 + $0x1e8] sm:$0xff] }
 0xbd7   :  { %v1586_v34 = vrot.slane %v1585_v32, 2  ;;  %v1593_v35 = vadd.f32 %v1592_v33, %v1591_v31  ;;  %v1892_v31 = vld [vmem:[%s4642_s2 + $0x1d8] sm:$0xff]  ;;  %v1889_v33 = vld [vmem:[%s4642_s2 + $0x1c0] sm:$0xff] }
 0xbd9   :  { %v1587_v36 = vadd.f32 %v1586_v34, %v1585_v32  ;;  %v1594_v2 = vrot.slane %v1593_v35, 2  ;;  %v1896_v34 = vld [vmem:[%s4642_s2 + $0x1f8] sm:$0xff] }
 0xbdb   :  { %v1588_v18 = vrot.slane %v1587_v36, 1  ;;  %v1595_v8 = vadd.f32 %v1594_v2, %v1593_v35 }
 0xbdd   :  { %v1596_v20 = vrot.slane %v1595_v8, 1  ;;  %v1589_v37 = vadd.f32 %v1588_v18, %v1587_v36  ;;  %v3624_v36 = vpack.c.bf16 %v1892_v31, %v1890_v30  ;;  %v3628_v18 = vpack.c.bf16 %v1896_v34, %v1894_v58 }
 0xbdf   :  { %v1597_v38 = vadd.f32 %v1596_v20, %v1595_v8  ;;  %3323 = vmatmul.mubr.msk.f32.vlgmr.msra.gmra.mrb[22].mxu1 %vm343_vm3, %v1589_v37  ;;  %v1893_v8 = vld [vmem:[%s4642_s2 + $0x1e0] sm:$0xff]  ;;  %v1895_v20 = vld [vmem:[%s4642_s2 + $0x1f0] sm:$0xff]  ;;  %v1898_v37 = vld [vmem:[%s4642_s2 + $0x208] sm:$0xff] }
 0xbe0   :  { %3346 = vmatprep.mubr.msk.f32.mxu1 %vm970_vm7, %v1770_v39 }
 0xbe1   :  { %3342 = vmatmul.mubr.msk.f32.vlgmr.msra.gmra.mrb[44].mxu0 %vm343_vm3, %v1597_v38  ;;  %v1900_v38 = vld [vmem:[%s4642_s2 + $0x218] sm:$0xff] }
 0xbe2   :  { %3356 = vmatpush3.msra.mxu0 %v2030_v45  ;;  %3357 = vmatprep.mubr.msk.f32.mxu0 %vm970_vm7, %v1770_v39  ;;  %v3630_v39 = vpack.c.bf16 %v1895_v20, %v1893_v8  ;;  %v3632_v46 = vpack.c.bf16 %v1900_v38, %v1898_v37  ;;  %v2955_v8 = vld [vmem:[%s4644_s4 + $0x10] sm:$0x7] }
 0xbe3   :  { %3641 = vmatprep.subr.bf16.mxu0 %v3640_v48  ;;  %v1899_v48 = vld [vmem:[%s4642_s2 + $0x210] sm:$0xff] }
 0xbe4   :  { %v3634_v51 = vpack.c.bf16 %v1899_v48, %v1897_v47 }
 0xbe5   :  { %3358 = vmatmul.mubr.msk.f32.vlgmr.msra.gmra.mrb[46].mxu0 %vm970_vm7, %v4330_v40 }
 0xbe6   :  { %3360 = vmatprep.mubr.msk.f32.mxu0 %vm970_vm7, %v4338_v41  ;;  %3643 = vmatpush1.bf16.msra.mxu0 %v3642_v54  ;;  %v1901_v54 = vld [vmem:[%s4642_s2 + $0x220] sm:$0xff] }
 0xbe7   :  { %3645 = vmatprep.subr.bf16.mxu0 %v3644_v61 }
 0xbe9   :  { %3361 = vmatmul.mubr.msk.f32.gmra.mrb[48].mxu0 %vm970_vm7, %v4343_v42 }
 0xbea   :  { %3363 = vmatprep.mubr.msk.f32.mxu0 %vm970_vm7, %v4352_v43  ;;  %3647 = vmatpush1.bf16.msra.mxu0 %v3646_v3 }
 0xbeb   :  { %3649 = vmatprep.subr.bf16.mxu0 %v3648_v7 }
 0xbed   :  { %3364 = vmatmul.mubr.msk.f32.gmra.mrb[50].mxu0 %vm970_vm7, %v4357_v44 }
 0xbee   :  { %2224 = vmatprep.mubr.f32.mxu0 %v3747_v26  ;;  %3651 = vmatpush1.bf16.msra.mxu0 %v3650_v11 }
 0xcb2   :  { %v1667_v12 = vpop.f32.mrb[22].mxu1 }
 0xcb3   :  { %v1671_v13 = vmul.f32 0.03125, %v1667_v12  ;;  %v3324_v14 = vpop.f32.mrb[23].mxu1 }
 0xcb4   :  { %v1741_v15 = vpop.f32.mrb[44].mxu0 }
 0xcb5   :  { %v1746_v45 = vmul.f32 %v1671_v13, %v1671_v13  ;;  %v1745_v52 = vmul.f32 0.03125, %v1741_v15  ;;  %v3343_v16 = vpop.f32.mrb[45].mxu0  ;;  %v1751_v22 = vrot.slane %v1671_v13, %v3920_v6 }
 0xcb7   :  { %v1747_v17 = vsub.f32 %v1745_v52, %v1746_v45  ;;  %v1752_v59 = vsub.f32 %v4314_v27, %v1751_v22  ;;  %v1891_v27 = vld [vmem:[%s4642_s2 + $0x1d0] sm:$0xff] }
 0xcb8   :  { %v3626_v2 = vpack.c.bf16 %v1891_v27, %v1889_v33  ;;  %v3359_v3 = vpop.f32.mrb[46].mxu0 }
 0xcb9   :  { %v1753_v19 = vadd.f32 1e-05, %v1747_v17  ;;  %v2097_v4 = vpop.f32.mrb[47].mxu0 }
 0xcbb   :  { %3719 = vrsqrt.f32 %v1753_v19 }
 0xcbc   :  { %v3362_v5 = vpop.f32.mrb[48].mxu0 }
 0xcbd   :  { %v2107_v7 = vpop.f32.mrb[49].mxu0 }
 0xcc0   :  { %v3365_v9 = vpop.f32.mrb[50].mxu0 }
 0xcc1   :  { %v2117_v10 = vpop.f32.mrb[51].mxu0 }
 0xcc5   :  { %v3720_v23 = vpop.eup %3719 }
 0xcc6   :  { %v1758_v25 = vmul.f32 %v3720_v23, %v1756_v21 }
 0xcc8   :  { %v1762_v0 = vrot.slane %v1758_v25, %v3920_v6 }
 0xcca   :  { %v1763_v29 = vmul.f32 %v1762_v0, %v1752_v59 }
 0xccc   :  { %v1768_v32 = vadd.f32 %v1767_v28, %v1763_v29 }
 0xcce   :  { %v1769_v35 = vmax.f32 %v1768_v32, 0.0 }
 0xcd0   :  { %3344 = vmatprep.subr.mxu1 %v1769_v35 }
 0xcd1   :  { %3345 = vmatpush3.msra.mxu1 %v1769_v35 }
 0xcd2   :  { %3347 = vmatmul.mubr.msk.f32.vlgmr.msra.gmra.mrb[24].mxu1 %vm970_vm7, %v4330_v40  ;;  %3625 = vmatprep.subr.bf16.mxu1 %v3624_v36  ;;  %v1902_v40 = vld [vmem:[%s4642_s2 + $0x228] sm:$0xff] }
 0xcd3   :  { %3349 = vmatprep.mubr.msk.f32.mxu1 %vm970_vm7, %v4338_v41  ;;  %3627 = vmatpush1.bf16.msra.mxu1 %v3626_v2  ;;  %v1904_v41 = vld [vmem:[%s4642_s2 + $0x238] sm:$0xff] }
 0xcd4   :  { %3629 = vmatprep.subr.bf16.mxu1 %v3628_v18  ;;  %v3636_v53 = vpack.c.bf16 %v1904_v41, %v1902_v40 }
 0xcd6   :  { %3350 = vmatmul.mubr.msk.f32.gmra.mrb[26].mxu1 %vm970_vm7, %v4343_v42  ;;  %v3638_v42 = vpack.c.bf16 %v1903_v56, %v1901_v54 }
 0xcd7   :  { %3352 = vmatprep.mubr.msk.f32.mxu1 %vm970_vm7, %v4352_v43  ;;  %3631 = vmatpush1.bf16.msra.mxu1 %v3630_v39  ;;  %v2139_v43 = vld [vmem:[%s4642_s2 + $0x2a8] sm:$0xff] }
 0xcd8   :  { %3633 = vmatprep.subr.bf16.mxu1 %v3632_v46  ;;  %v3652_v61 = vpack.c.bf16 %v2141_v57, %v2139_v43  ;;  %v2274_v46 = vrot.slane %v2955_v8, %v3920_v6 }
 0xcda   :  { %3353 = vmatmul.mubr.msk.f32.gmra.mrb[28].mxu1 %vm970_vm7, %v4357_v44  ;;  %v2138_v44 = vld [vmem:[%s4642_s2 + $0x2a0] sm:$0xff]  ;;  %3653 = vmatprep.subr.bf16.mxu0 %v3652_v61 }
 0xcdb   :  { %3635 = vmatpush1.bf16.msra.mxu1 %v3634_v51  ;;  %1987 = vmatprep.mubr.f32.mxu1 %v3747_v26  ;;  %v3654_v1 = vpack.c.bf16 %v2140_v62, %v2138_v44 }
 0xcdc   :  { %3637 = vmatprep.subr.bf16.mxu1 %v3636_v53 }
 0xcdd   :  { %3655 = vmatpush1.bf16.msra.mxu0 %v3654_v1 }
 0xcde   :  { %3668 = vmatprep.subr.bf16.mxu0 %v3749_v50 }
 0xcdf   :  { %3639 = vmatpush1.bf16.msra.mxu1 %v3638_v42 }
 0xce0   :  { %3656 = vmatprep.subr.bf16.mxu1 %v3749_v50  ;;  %2949 = vmatmul.mubr.msk.f32.vlgmr.msra.gmra.mrb[52].mxu0 %vm343_vm3, %v2097_v4 }
 0xce1   :  { %2229 = vmatprep.mubr.f32.mxu0 %v3747_v26  ;;  %3670 = vmatpush3.bf16.msra.mxu0 %v3878_v49 }
 0xce2   :  { %3671 = vmatprep.subr.bf16.mxu0 %v3749_v50 }
 0xce4   :  { %2950 = vmatmul.mubr.msk.f32.gmra.mrb[54].mxu0 %vm343_vm3, %v3359_v3 }
 0xce5   :  { %2234 = vmatprep.mubr.f32.mxu0 %v3747_v26  ;;  %3673 = vmatpush3.bf16.msra.mxu0 %v3889_v55 }
 0xce6   :  { %3674 = vmatprep.subr.bf16.mxu0 %v3749_v50 }
 0xce8   :  { %2951 = vmatmul.mubr.msk.f32.gmra.mrb[56].mxu0 %vm343_vm3, %v2107_v7 }
 0xce9   :  { %2239 = vmatprep.mubr.f32.mxu0 %v3747_v26  ;;  %3676 = vmatpush3.bf16.msra.mxu0 %v3900_v60 }
 0xcea   :  { %3677 = vmatprep.subr.bf16.mxu0 %v3749_v50 }
 0xcec   :  { %2952 = vmatmul.mubr.msk.f32.gmra.mrb[58].mxu0 %vm343_vm3, %v3362_v5 }
 0xced   :  { %2244 = vmatprep.mubr.f32.mxu0 %v3747_v26  ;;  %3679 = vmatpush3.bf16.msra.mxu0 %v3911_v63 }
 0xcf0   :  { %2953 = vmatmul.mubr.msk.f32.gmra.mrb[60].mxu0 %vm343_vm3, %v2117_v10 }
 0xcf1   :  { %2249 = vmatprep.mubr.f32.mxu0 %v3747_v26 }
 0xcf4   :  { %2954 = vmatmul.mubr.msk.f32.gmra.mrb[62].mxu0 %vm343_vm3, %v3365_v9 }
 0xcf5   :  { %3401 = vmatprep.mubr.msk.f32.mxu0 %vm3750_vm1, %v3747_v26 }
 0xda5   :  { %v3348_v11 = vpop.f32.mrb[24].mxu1 }
 0xda6   :  { %v1860_v12 = vpop.f32.mrb[25].mxu1 }
 0xda7   :  { %2937 = vmatmul.mubr.msk.f32.vlgmr.msra.gmra.mrb[30].mxu1 %vm343_vm3, %v1860_v12 }
 0xda8   :  { %1992 = vmatprep.mubr.f32.mxu1 %v3747_v26  ;;  %3658 = vmatpush3.bf16.msra.mxu1 %v3878_v49 }
 0xda9   :  { %v3351_v13 = vpop.f32.mrb[26].mxu1  ;;  %3659 = vmatprep.subr.bf16.mxu1 %v3749_v50 }
 0xdaa   :  { %v1870_v14 = vpop.f32.mrb[27].mxu1 }
 0xdab   :  { %2938 = vmatmul.mubr.msk.f32.gmra.mrb[32].mxu1 %vm343_vm3, %v3348_v11 }
 0xdac   :  { %1997 = vmatprep.mubr.f32.mxu1 %v3747_v26  ;;  %3661 = vmatpush3.bf16.msra.mxu1 %v3889_v55 }
 0xdad   :  { %v3354_v15 = vpop.f32.mrb[28].mxu1  ;;  %3662 = vmatprep.subr.bf16.mxu1 %v3749_v50 }
 0xdae   :  { %v1880_v45 = vpop.f32.mrb[29].mxu1 }
 0xdaf   :  { %2939 = vmatmul.mubr.msk.f32.gmra.mrb[34].mxu1 %vm343_vm3, %v1870_v14 }
 0xdb0   :  { %2002 = vmatprep.mubr.f32.mxu1 %v3747_v26  ;;  %3664 = vmatpush3.bf16.msra.mxu1 %v3900_v60 }
 0xdb1   :  { %3665 = vmatprep.subr.bf16.mxu1 %v3749_v50 }
 0xdb3   :  { %2940 = vmatmul.mubr.msk.f32.gmra.mrb[36].mxu1 %vm343_vm3, %v3351_v13  ;;  %v2226_v49 = vpop.f32.mrb[52].mxu0 }
 0xdb4   :  { %2007 = vmatprep.mubr.f32.mxu1 %v3747_v26  ;;  %3667 = vmatpush3.bf16.msra.mxu1 %v3911_v63  ;;  %v2228_v55 = vpop.f32.mrb[53].mxu0 }
 0xdb7   :  { %2941 = vmatmul.mubr.msk.f32.gmra.mrb[38].mxu1 %vm343_vm3, %v1880_v45  ;;  %v2231_v60 = vpop.f32.mrb[54].mxu0 }
 0xdb8   :  { %2012 = vmatprep.mubr.f32.mxu1 %v3747_v26  ;;  %v2233_v52 = vpop.f32.mrb[55].mxu0 }
 0xdbb   :  { %2942 = vmatmul.mubr.msk.f32.gmra.mrb[40].mxu1 %vm343_vm3, %v3354_v15  ;;  %v2236_v50 = vpop.f32.mrb[56].mxu0 }
 0xdbc   :  { %3382 = vmatprep.mubr.msk.f32.mxu1 %vm3750_vm1, %v3747_v26  ;;  %v2238_v16 = vpop.f32.mrb[57].mxu0 }
 0xdbf   :  { %v2241_v17 = vpop.f32.mrb[58].mxu0 }
 0xdc0   :  { %v2243_v19 = vpop.f32.mrb[59].mxu0 }
 0xdc3   :  { %v2246_v21 = vpop.f32.mrb[60].mxu0 }
 0xdc4   :  { %v2247_v22 = vpop.f32.mrb[61].mxu0 }
 0xdc7   :  { %v2251_v63 = vpop.f32.mrb[62].mxu0 }
 0xdc8   :  { %v2252_v25 = vpop.f32.mrb[63].mxu0  ;;  %v2456_v63 = vrot.slane %v2955_v8, 1 }
 0xe7a   :  { %v1989_v23 = vpop.f32.mrb[30].mxu1 }
 0xe7b   :  { %v1991_v59 = vpop.f32.mrb[31].mxu1 }
 0xe7e   :  { %v1994_v0 = vpop.f32.mrb[32].mxu1 }
 0xe7f   :  { %v1996_v28 = vpop.f32.mrb[33].mxu1 }
 0xe82   :  { %v1999_v29 = vpop.f32.mrb[34].mxu1 }
 0xe83   :  { %2020 = vrot.lane.b32.xlu1 %v1999_v29, %s3748_s7  ;;  %v2001_v26 = vpop.f32.mrb[35].mxu1 }
 0xe84   :  { %v2468_v26 = vrot.slane %v2955_v8, %v4011_v24  ;;  %v2648_v24 = vld [vmem:[%s4642_s2 + $0x2e0] sm:$0xff] }
 0xe85   :  { %v2474_v8 = vld [vmem:[%s4641_s1 + $0xc0] sm:$0xff] }
 0xe86   :  { %v2004_v30 = vpop.f32.mrb[36].mxu1 }
 0xe87   :  { %2257 = vrot.lane.b32.xlu1 %v2236_v50, %s3748_s7  ;;  %2022 = vrot.lane.b32.xlu0 %v2004_v30, %s3748_s7  ;;  %v2006_v31 = vpop.f32.mrb[37].mxu1 }
 0xe8a   :  { %v2009_v32 = vpop.f32.mrb[38].mxu1 }
 0xe8b   :  { %2259 = vrot.lane.b32.xlu0 %v2241_v17, %s3748_s7  ;;  %v2010_v33 = vpop.f32.mrb[39].mxu1 }
 0xe8e   :  { %v2014_v27 = vpop.f32.mrb[40].mxu1 }
 0xe8f   :  { %v2015_v58 = vpop.f32.mrb[41].mxu1  ;;  %v2646_v27 = vld [vmem:[%s4642_s2 + $0x2c0] sm:$0xff] }
 0xef5   :  { %v2021_v34 = vpop.permute.xlu1 %2020 }
 0xef6   :  { %v2026_v35 = vadd.f32 %v2021_v34, %v1989_v23 }
 0xef8   :  { %v2028_v36 = vadd.f32 %v2026_v35, %v2010_v33 }
 0xef9   :  { %v2258_v2 = vpop.permute.xlu1 %2257  ;;  %v2023_v18 = vpop.permute.xlu0 %2022 }
 0xefa   :  { %v2263_v20 = vadd.f32 %v2258_v2, %v2226_v49  ;;  %v2027_v37 = vadd.f32 %v2023_v18, %v1994_v0  ;;  %v2473_v49 = vld [vmem:[%s4641_s1 + $0xb8] sm:$0xff]  ;;  %v2649_v18 = vld [vmem:[%s4642_s2 + $0x2f0] sm:$0xff] }
 0xefc   :  { %v2029_v38 = vadd.f32 %v2027_v37, %v2015_v58  ;;  %v2265_v39 = vadd.f32 %v2263_v20, %v2247_v22  ;;  %v2647_v58 = vld [vmem:[%s4642_s2 + $0x2d0] sm:$0xff]  ;;  %v2475_v20 = vld [vmem:[%s4641_s1 + $0xc8] sm:$0xff]  ;;  %v3688_v37 = vpack.c.bf16 %v2649_v18, %v2648_v24 }
 0xefd   :  { %v2260_v47 = vpop.permute.xlu0 %2259  ;;  %v3684_v2 = vpack.c.bf16 %v2647_v58, %v2646_v27 }
 0xefe   :  { %v2267_v48 = vadd.f32 %v2265_v39, %v2028_v36  ;;  %v2264_v40 = vadd.f32 %v2260_v47, %v2231_v60  ;;  %v2651_v39 = vld [vmem:[%s4642_s2 + $0x310] sm:$0xff]  ;;  %v2477_v47 = vld [vmem:[%s4641_s1 + $0xd8] sm:$0xff] }
 0xf00   :  { %v2275_v41 = vadd.f32 %v2274_v46, %v2267_v48  ;;  %v2266_v51 = vadd.f32 %v2264_v40, %v2252_v25  ;;  %v2652_v40 = vld [vmem:[%s4642_s2 + $0x320] sm:$0xff] }
 0xf02   :  { %v2268_v53 = vadd.f32 %v2266_v51, %v2029_v38  ;;  %v2286_v54 = vmul.f32 %v2275_v41, %v2275_v41  ;;  %v2277_v42 = vsel %vm343_vm3, %v2275_v41, 0.0  ;;  %v2650_v38 = vld [vmem:[%s4642_s2 + $0x300] sm:$0xff] }
 0xf03   :  { %v3692_v48 = vpack.c.bf16 %v2651_v39, %v2650_v38  ;;  %v2478_v51 = vld [vmem:[%s4641_s1 + $0xe0] sm:$0xff] }
 0xf04   :  { %v2276_v56 = vadd.f32 %v2274_v46, %v2268_v53  ;;  %v2288_v44 = vsel %vm343_vm3, %v2286_v54, 0.0  ;;  %v2476_v46 = vld [vmem:[%s4641_s1 + $0xd0] sm:$0xff]  ;;  %v2479_v53 = vld [vmem:[%s4641_s1 + $0xe8] sm:$0xff] }
 0xf06   :  { %v2278_v43 = vsel %vm343_vm3, %v2276_v56, 0.0  ;;  %v2287_v57 = vmul.f32 %v2276_v56, %v2276_v56 }
 0xf07   :  { %v2279_v61 = vadd.f32 %v2278_v43, %v2277_v42  ;;  %v2481_v42 = vld [vmem:[%s4641_s1 + $0xf8] sm:$0xff]  ;;  %v2482_v43 = vld [vmem:[%s4641_s1 + $0x100] sm:$0xff] }
 0xf08   :  { %v2289_v62 = vsel %vm343_vm3, %v2287_v57, 0.0  ;;  %v2483_v57 = vld [vmem:[%s4641_s1 + $0x108] sm:$0xff] }
 0xf09   :  { %v2280_v1 = vrot.slane %v2279_v61, 4  ;;  %v2290_v3 = vadd.f32 %v2289_v62, %v2288_v44 }
 0xf0b   :  { %v2281_v4 = vadd.f32 %v2280_v1, %v2279_v61  ;;  %v2291_v5 = vrot.slane %v2290_v3, 4  ;;  %v2484_v61 = vld [vmem:[%s4641_s1 + $0x110] sm:$0xff] }
 0xf0d   :  { %v2282_v7 = vrot.slane %v2281_v4, 2  ;;  %v2292_v9 = vadd.f32 %v2291_v5, %v2290_v3 }
 0xf0f   :  { %v2283_v10 = vadd.f32 %v2282_v7, %v2281_v4  ;;  %v2293_v11 = vrot.slane %v2292_v9, 2 }
 0xf11   :  { %v2284_v12 = vrot.slane %v2283_v10, 1  ;;  %v2294_v13 = vadd.f32 %v2293_v11, %v2292_v9 }
 0xf13   :  { %v2285_v14 = vadd.f32 %v2284_v12, %v2283_v10  ;;  %v2295_v15 = vrot.slane %v2294_v13, 1 }
 0xf15   :  { %3383 = vmatmul.mubr.msk.f32.vlgmr.msra.gmra.mrb[42].mxu1 %vm343_vm3, %v2285_v14  ;;  %v2296_v45 = vadd.f32 %v2295_v15, %v2294_v13 }
 0xf16   :  { %3408 = vmatprep.mubr.msk.f32.mxu1 %vm542_vm5, %v2473_v49 }
 0xf17   :  { %3402 = vmatmul.mubr.msk.f32.vlgmr.msra.gmra.mrb[64].mxu0 %vm343_vm3, %v2296_v45 }
 0xfe8   :  { %v2366_v55 = vpop.f32.mrb[42].mxu1 }
 0xfe9   :  { %v2370_v60 = vmul.f32 0.0078125, %v2366_v55  ;;  %v3384_v52 = vpop.f32.mrb[43].mxu1 }
 0xfea   :  { %v2440_v50 = vpop.f32.mrb[64].mxu0 }
 0xfeb   :  { %v2445_v16 = vmul.f32 %v2370_v60, %v2370_v60  ;;  %v2444_v17 = vmul.f32 0.0078125, %v2440_v50  ;;  %v3403_v19 = vpop.f32.mrb[65].mxu0  ;;  %v2450_v23 = vrot.slane %v2370_v60, %v3920_v6 }
 0xfed   :  { %v2446_v21 = vsub.f32 %v2444_v17, %v2445_v16  ;;  %v2451_v0 = vsub.f32 %v2275_v41, %v2450_v23  ;;  %v2452_v28 = vsub.f32 %v2276_v56, %v2450_v23  ;;  %v2653_v41 = vld [vmem:[%s4642_s2 + $0x330] sm:$0xff] }
 0xfee   :  { %v3696_v54 = vpack.c.bf16 %v2653_v41, %v2652_v40  ;;  %v2480_v56 = vld [vmem:[%s4641_s1 + $0xf0] sm:$0xff]  ;;  %s3751_s1 = smov 112  }
 0xfef   :  { %v2453_v22 = vadd.f32 1e-05, %v2446_v21 }
 0xff1   :  { %3721 = vrsqrt.f32 %v2453_v22 }
 0xffb   :  { %v3722_v25 = vpop.eup %3721 }
 0xffc   :  { %v2458_v59 = vmul.f32 %v3722_v25, %v2456_v63  ;;  %v2982_v25 = vld [vmem:[%s4644_s4 + $0x14] sm:$0x7]  ;;  %s2874_s4 = sshll.u32 %s3753_s13, 4  ;;  %s2875_s4 = int_to_ptr.vmem [resolvable:$true] %s2874_s4 }
 0xffd   :  { %s3723_s14 = scalar_lea.vmem %s2875_s4, 512  ;;  %p3728_p1 = scmp.lt.s32.totalorder %s2875_s4, %s2875_s4 }
 0xffe   :  { %v2462_v29 = vrot.slane %v2458_v59, %v3920_v6  ;;  %p3724_p0 = scmp.ne.s32.totalorder %s2875_s4, %s3723_s14  ;;  %p3729_p2 = scmp.lt.s32.totalorder %s3723_s14, %s3723_s14 }
0x1000   :  { %v2463_v30 = vmul.f32 %v2462_v29, %v2451_v0  ;;  %v2464_v31 = vmul.f32 %v2462_v29, %v2452_v28  ;;  %v2860_v28 = vrot.slane %v2982_v25, %v3920_v6  ;;  %p3730_p3 = por %p3729_p2, %p3728_p1 }
0x1002   :  { %v2469_v32 = vadd.f32 %v2468_v26, %v2463_v30  ;;  %v2470_v33 = vadd.f32 %v2468_v26, %v2464_v31  ;;  %p3731_p4 = pnand %p3730_p3, %p3724_p0 }
0x1004   :  { %v2471_v34 = vmax.f32 %v2469_v32, 0.0  ;;  %v2472_v35 = vmax.f32 %v2470_v33, 0.0 }
0x1006   :  { %v3680_v36 = vpack.c.bf16 %v2472_v35, %v2471_v34 }
0x1008   :  { %3681 = vmatprep.subr.bf16.mxu1 %v3680_v36 }
0x1009   :  { %3683 = vmatpush3.bf16.msra.mxu1 %v3680_v36 }
0x100a   :  { %3685 = vmatprep.subr.bf16.mxu1 %v3684_v2 }
0x100c   :  { %3409 = vmatmul.mubr.msk.f32.vlgmr.msra.gmra.mrb[44].mxu1 %vm542_vm5, %v2474_v8 }
0x100d   :  { %3411 = vmatprep.mubr.msk.f32.mxu1 %vm542_vm5, %v2475_v20  ;;  %3687 = vmatpush3.bf16.msra.mxu1 %v3684_v2 }
0x100e   :  { %3689 = vmatprep.subr.bf16.mxu1 %v3688_v37 }
0x1010   :  { %3412 = vmatmul.mubr.msk.f32.gmra.mrb[46].mxu1 %vm542_vm5, %v2476_v46 }
0x1011   :  { %3414 = vmatprep.mubr.msk.f32.mxu1 %vm542_vm5, %v2477_v47  ;;  %3691 = vmatpush3.bf16.msra.mxu1 %v3688_v37 }
0x1012   :  { %3693 = vmatprep.subr.bf16.mxu1 %v3692_v48 }
0x1014   :  { %3415 = vmatmul.mubr.msk.f32.gmra.mrb[48].mxu1 %vm542_vm5, %v2478_v51 }
0x1015   :  { %3417 = vmatprep.mubr.msk.f32.mxu1 %vm542_vm5, %v2479_v53  ;;  %3695 = vmatpush3.bf16.msra.mxu1 %v3692_v48 }
0x1016   :  { %3697 = vmatprep.subr.bf16.mxu1 %v3696_v54 }
0x1018   :  { %3418 = vmatmul.mubr.msk.f32.gmra.mrb[50].mxu1 %vm542_vm5, %v2480_v56 }
0x1019   :  { %3420 = vmatprep.mubr.msk.f32.mxu1 %vm542_vm5, %v2481_v42  ;;  %3699 = vmatpush3.bf16.msra.mxu1 %v3696_v54 }
0x101c   :  { %3421 = vmatmul.mubr.msk.f32.gmra.mrb[52].mxu1 %vm542_vm5, %v2482_v43 }
0x101d   :  { %3423 = vmatprep.mubr.msk.f32.mxu1 %vm542_vm5, %v2483_v57 }
0x1020   :  { %3424 = vmatmul.mubr.msk.f32.gmra.mrb[54].mxu1 %vm542_vm5, %v2484_v61 }
0x10df   :  { %v3410_v44 = vpop.f32.mrb[44].mxu1 }
0x10e0   :  { %v2587_v62 = vpop.f32.mrb[45].mxu1 }
0x10e1   :  { %3442 = vmatprep.mubr.msk.f32.mxu1 %vm343_vm3, %v2587_v62 }
0x10e2   :  { %3443 = vmatmul.mubr.msk.f32.vlgmr.msra.gmra.mrb[56].mxu1 %vm343_vm3, %v3410_v44 }
0x10e3   :  { %v3413_v1 = vpop.f32.mrb[46].mxu1 }
0x10e4   :  { %v2597_v3 = vpop.f32.mrb[47].mxu1 }
0x10e5   :  { %3445 = vmatprep.mubr.msk.f32.mxu1 %vm343_vm3, %v2597_v3 }
0x10e6   :  { %3446 = vmatmul.mubr.msk.f32.gmra.mrb[58].mxu1 %vm343_vm3, %v3413_v1 }
0x10e7   :  { %v3416_v4 = vpop.f32.mrb[48].mxu1 }
0x10e8   :  { %v2607_v5 = vpop.f32.mrb[49].mxu1 }
0x10e9   :  { %3448 = vmatprep.mubr.msk.f32.mxu1 %vm343_vm3, %v2607_v5 }
0x10ea   :  { %3449 = vmatmul.mubr.msk.f32.gmra.mrb[60].mxu1 %vm343_vm3, %v3416_v4 }
0x10eb   :  { %v3419_v7 = vpop.f32.mrb[50].mxu1 }
0x10ec   :  { %v2617_v9 = vpop.f32.mrb[51].mxu1 }
0x10ed   :  { %3451 = vmatprep.mubr.msk.f32.mxu1 %vm343_vm3, %v2617_v9 }
0x10ee   :  { %3452 = vmatmul.mubr.msk.f32.gmra.mrb[62].mxu1 %vm343_vm3, %v3419_v7 }
0x10ef   :  { %v3422_v10 = vpop.f32.mrb[52].mxu1 }
0x10f0   :  { %v2627_v11 = vpop.f32.mrb[53].mxu1 }
0x10f1   :  { %3454 = vmatprep.mubr.msk.f32.mxu1 %vm343_vm3, %v2627_v11 }
0x10f2   :  { %3455 = vmatmul.mubr.msk.f32.gmra.mrb[64].mxu1 %vm343_vm3, %v3422_v10 }
0x10f3   :  { %v3425_v12 = vpop.f32.mrb[54].mxu1 }
0x10f4   :  { %v2637_v13 = vpop.f32.mrb[55].mxu1 }
0x10f5   :  { %3457 = vmatprep.mubr.msk.f32.mxu1 %vm343_vm3, %v2637_v13 }
0x10f6   :  { %3458 = vmatmul.mubr.msk.f32.gmra.mrb[66].mxu1 %vm343_vm3, %v3425_v12 }
0x11b5   :  { %v3444_v14 = vpop.f32.mrb[56].mxu1 }
0x11b6   :  { %v2756_v15 = vpop.f32.mrb[57].mxu1 }
0x11b9   :  { %v3447_v45 = vpop.f32.mrb[58].mxu1 }
0x11ba   :  { %v2766_v49 = vpop.f32.mrb[59].mxu1 }
0x11bd   :  { %v3450_v55 = vpop.f32.mrb[60].mxu1 }
0x11be   :  { %2821 = vrot.lane.b32.xlu0 %v3450_v55, %s3751_s1  ;;  %v2776_v60 = vpop.f32.mrb[61].mxu1 }
0x11bf   :  { %2819 = vrot.lane.b32.xlu1 %v2776_v60, %s3751_s1 }
0x11c1   :  { %v3453_v52 = vpop.f32.mrb[62].mxu1 }
0x11c2   :  { %2825 = vrot.lane.b32.xlu0 %v3453_v52, %s3751_s1  ;;  %v2786_v50 = vpop.f32.mrb[63].mxu1 }
0x11c3   :  { %2823 = vrot.lane.b32.xlu1 %v2786_v50, %s3751_s1 }
0x11c5   :  { %v3456_v16 = vpop.f32.mrb[64].mxu1 }
0x11c6   :  { %2841 = vrot.lane.b32.xlu0 %v3456_v16, %s3752_s11  ;;  %v2796_v17 = vpop.f32.mrb[65].mxu1 }
0x11c7   :  { %2839 = vrot.lane.b32.xlu1 %v2796_v17, %s3752_s11 }
0x11c9   :  { %v3459_v19 = vpop.f32.mrb[66].mxu1 }
0x11ca   :  { %2845 = vrot.lane.b32.xlu0 %v3459_v19, %s3752_s11  ;;  %v2806_v21 = vpop.f32.mrb[67].mxu1 }
0x11cb   :  { %2843 = vrot.lane.b32.xlu1 %v2806_v21, %s3752_s11 }
0x1230   :  { %v2822_v22 = vpop.permute.xlu0 %2821 }
0x1231   :  { %v2820_v63 = vpop.permute.xlu1 %2819  ;;  %v2832_v0 = vadd.f32 %v3444_v14, %v2822_v22 }
0x1232   :  { %v2831_v29 = vadd.f32 %v2820_v63, %v2756_v15 }
0x1234   :  { %v2826_v23 = vpop.permute.xlu0 %2825 }
0x1235   :  { %v2824_v59 = vpop.permute.xlu1 %2823  ;;  %v2834_v33 = vadd.f32 %v3447_v45, %v2826_v23 }
0x1236   :  { %v2833_v58 = vadd.f32 %v2824_v59, %v2766_v49 }
0x1238   :  { %v2842_v26 = vpop.permute.xlu0 %2841 }
0x1239   :  { %v2852_v30 = vadd.f32 %v2842_v26, %v2832_v0  ;;  %v2840_v31 = vpop.permute.xlu1 %2839 }
0x123a   :  { %v2851_v32 = vadd.f32 %v2840_v31, %v2831_v29 }
0x123b   :  { %v2862_v27 = vadd.f32 %v2860_v28, %v2852_v30 }
0x123c   :  { %v2861_v34 = vadd.f32 %v2860_v28, %v2851_v32  ;;  %v2846_v35 = vpop.permute.xlu0 %2845 }
0x123d   :  { %2866 = vst.msk [vmem:[#allocation2 + $0x8] sm:$0xff] %vm542_vm5, %v2862_v27  ;;  %v2854_v36 = vadd.f32 %v2846_v35, %v2834_v33  ;;  %v2844_v2 = vpop.permute.xlu1 %2843 }
0x123e   :  { %2865 = vst.msk [vmem:[#allocation2] sm:$0xff] %vm542_vm5, %v2861_v34  ;;  %v2853_v24 = vadd.f32 %v2844_v2, %v2833_v58 }
0x123f   :  { %v2864_v6 = vadd.f32 %v2860_v28, %v2854_v36 }
0x1240   :  { %v2863_v18 = vadd.f32 %v2860_v28, %v2853_v24 }
0x1241   :  { %2868 = vst.msk [vmem:[#allocation2 + $0x18] sm:$0xff] %vm542_vm5, %v2864_v6 }
0x1242   :  { %2867 = vst.msk [vmem:[#allocation2 + $0x10] sm:$0xff] %vm542_vm5, %v2863_v18 }
0x1243   :  { %3734 = shalt.err (!%p3731_p4)
}
0x1244   :  { %s3735_s17 = scalar_lea.hbm %s4645_s5, 512 }
0x1245   :  { %p3736_p5 = scmp.ne.s32.totalorder %s4645_s5, %s3735_s17  ;;  %p3739_p6 = scmp.lt.u32.totalorder %s3735_s17, %s4645_s5 }
0x1247   :  { %p3741_p7 = pnand %p3739_p6, %p3736_p5 }
0x1249   :  { %3744 = shalt.err (!%p3741_p7)
}
0x124a   :  { %s3754_s22 = smov 128   ;;  %s3755_s23 = smov 8  }
0x124b   :  { %2880 = dma.vmem_to_hbm [thread:$0]  %s2875_s4, 512, %s4645_s5, [#allocation3], %s3754_s22, %s3754_s22, %s3755_s23  }
0x124c   :  { %3745 = dma.done.wait [#allocation3], 512  }
0x124d   :  { %3746 = vsyncadd [#allocation3], 4294966784 }
0x124e   :  { %2884 = vsyncpa [#allocation3], 1 }

</bundles_post_ra>
